<compile_context>
chip_gen: v7x
topology: tpu7x:2x2x1
jax: 0.10.0
libtpu: 0.0.40
codegen_flags: <defaults>
</compile_context>

<pallas_src>
import numpy as np
import jax
import jax.numpy as jnp
from jax import lax
from jax.experimental import pallas as pl
from jax.experimental.pallas import tpu as pltpu


# ----------------------------- Pallas kernel ------------------------------- #
def _event_gru_kernel(state_ref, evp_ref, mx_ref, mh_ref, mc_ref, b_ref,
                      out_ref, hpad, xg_sc):
    """grid = (batch_blocks,); the full T-cell recurrence runs inside the kernel.

    state_ref : (Bg, H,   W*Ch)          initial hidden state (merged lane-dense)
    evp_ref   : (Bg, H+2, W*Cin)         event chunk 0, zero-padded along H
    mx_ref    : (3*W*Cin, T*3*W*Ch)      x-side band weights, ALL cells fused (bf16)
    mh_ref    : (T, 3*W*Ch, 2*W*Ch)      h-side gate band weights (bf16)
    mc_ref    : (T, 3*W*Ch, W*Ch)        h-side candidate band weights (bf16)
    b_ref     : (1, T*3*W*Ch)            [br|bz|bc] per cell, pre-broadcast over W (f32)
    out_ref   : (Bg, H, W*Ch)            h after the last cell
    hpad      : VMEM (Bg, H+2, W*Ch) f32 zero-halo padded recurrent buffer
    xg_sc     : VMEM (Bg*H, T*3*W*Ch) f32  hoisted x-side gates (+bias) for all cells
    """
    Bg, Hp2, _ = evp_ref.shape
    H = Hp2 - 2
    WCh = state_ref.shape[-1]
    M = Bg * H
    T = mh_ref.shape[0]
    G3 = 3 * WCh

    def cols(pad_ref):
        # im2col along H: (Bg, H+2, C) padded ref -> (M, 3*C) = [row-1 | row | row+1].
        # W taps + W zero padding live inside the band matrices, so the whole 3x3
        # conv becomes a single matmul against this LHS.
        C = pad_ref.shape[-1]
        return jnp.concatenate(
            [pad_ref[:, 0:H, :], pad_ref[:, 1:H + 1, :], pad_ref[:, 2:H + 2, :]],
            axis=-1).reshape(M, 3 * C).astype(jnp.bfloat16)

    # ---- hoisted x-side conv: all T cells' [r|z|cand] x-gates in ONE matmul ----
    xg_sc[...] = (jnp.dot(cols(evp_ref), mx_ref[...],
                          preferred_element_type=jnp.float32) + b_ref[...])

    # ---- init recurrent padded h buffer: zero only the two halo rows ----------
    hpad[:, 0:1, :] = jnp.zeros((Bg, 1, WCh), jnp.float32)
    hpad[:, H + 1:H + 2, :] = jnp.zeros((Bg, 1, WCh), jnp.float32)
    hpad[:, 1:H + 1, :] = state_ref[...]

    h = state_ref[...].reshape(M, WCh)            # f32 state carried in registers

    for t in range(T):                            # static unroll: T = event_length (small)
        xg = xg_sc[:, t * G3:(t + 1) * G3]        # (M, 3*W*Ch): [r_x | z_x | c_x] + bias
        hg = jnp.dot(cols(hpad), mh_ref[t],
                     preferred_element_type=jnp.float32)          # (M, 2*W*Ch)
        r = jax.nn.sigmoid(xg[:, :WCh] + hg[:, :WCh])
        z = jax.nn.sigmoid(xg[:, WCh:2 * WCh] + hg[:, WCh:2 * WCh])

        hpad[:, 1:H + 1, :] = (r * h).reshape(Bg, H, WCh)
        cand = jnp.dot(cols(hpad), mc_ref[t],
                       preferred_element_type=jnp.float32)        # (M, W*Ch)
        n = jnp.tanh(xg[:, 2 * WCh:] + cand)

        h = (1.0 - z) * h + z * n
        if t + 1 < T:                             # state for the next cell
            hpad[:, 1:H + 1, :] = h.reshape(Bg, H, WCh)

    out_ref[...] = h.reshape(Bg, H, WCh)


# ------------------------------- wrapper ----------------------------------- #
def event_gru_pallas(state_nchw, event_nchw, packed_params, *, batch_blocks=1):
    """state_nchw: (B, Ch, H, W); event_nchw: (B, T, Cin, H, W).
    batch_blocks=1 folds all of B into one block (best on single-TC v5e/v6e);
    batch_blocks=2 on v7x (B>=2) so the leading "parallel" axis feeds both cores."""
    B, Ch, H, W = state_nchw.shape
    _, T, Cin, _, _ = event_nchw.shape
    assert B % batch_blocks == 0
    Bg = B // batch_blocks
    WCh, WCin = W * Ch, W * Cin
    Mx, Mh, Mc, Bv = packed_params

    # PyTorch NCHW -> lane-dense merged (B, H, W*C); chunk-0 quirk applied here.
    state = jnp.transpose(state_nchw, (0, 2, 3, 1)).reshape(B, H, WCh)
    state = state.astype(jnp.float32)
    x = jnp.transpose(event_nchw[:, 0], (0, 2, 3, 1)).reshape(B, H, WCin)
    x = jnp.pad(x.astype(jnp.float32), ((0, 0), (1, 1), (0, 0)))   # zero H-halo

    out = pl.pallas_call(
        _event_gru_kernel,
        out_shape=jax.ShapeDtypeStruct((B, H, WCh), jnp.float32),
        grid_spec=pltpu.PrefetchScalarGridSpec(
            num_scalar_prefetch=0,
            grid=(batch_blocks,),
            in_specs=[
                pl.BlockSpec((Bg, H, WCh), lambda g: (g, 0, 0)),
                pl.BlockSpec((Bg, H + 2, WCin), lambda g: (g, 0, 0)),
                # weights/biases: whole-array VMEM-resident, constant index maps
                pl.BlockSpec((3 * WCin, T * 3 * WCh), lambda g: (0, 0)),
                pl.BlockSpec((T, 3 * WCh, 2 * WCh), lambda g: (0, 0, 0)),
                pl.BlockSpec((T, 3 * WCh, WCh), lambda g: (0, 0, 0)),
                pl.BlockSpec((1, T * 3 * WCh), lambda g: (0, 0)),
            ],
            out_specs=pl.BlockSpec((Bg, H, WCh), lambda g: (g, 0, 0)),
            scratch_shapes=[
                pltpu.VMEM((Bg, H + 2, WCh), jnp.float32),          # hpad
                pltpu.VMEM((Bg * H, T * 3 * WCh), jnp.float32),     # hoisted x-gates
            ],
        ),
        compiler_params=pltpu.CompilerParams(
            dimension_semantics=("parallel",),
            vmem_limit_bytes=32 * 1024 * 1024),
    )(state, x, Mx, Mh, Mc, Bv)
    return jnp.transpose(out.reshape(B, H, W, Ch), (0, 3, 1, 2))   # back to NCHW


# -------------------------- parameter construction ------------------------- #
def init_event_gru_params(key, T, Cin, Ch):
    """PyTorch-layout params per cell: (W_gates OIHW, b_gates, W_cand OIHW, b_cand)."""
    bound = 1.0 / (((Cin + Ch) * 9) ** 0.5)
    keys = jax.random.split(key, 4 * T)
    params = []
    for i in range(T):
        kg, kgb, kc, kcb = keys[4 * i:4 * i + 4]
        wg = jax.random.uniform(kg, (2 * Ch, Cin + Ch, 3, 3), jnp.float32, -bound, bound)
        bg = jax.random.uniform(kgb, (2 * Ch,), jnp.float32, -bound, bound)
        wc = jax.random.uniform(kc, (Ch, Cin + Ch, 3, 3), jnp.float32, -bound, bound)
        bc = jax.random.uniform(kcb, (Ch,), jnp.float32, -bound, bound)
        params.append((wg, bg, wc, bc))
    return params


def _band(w3, W):
    """w3: (3, Cin, Cout) dx taps for one dy -> block-tridiagonal (W*Cin, W*Cout)
    matrix implementing the conv along W including its zero padding."""
    Cin_, Cout = w3.shape[1], w3.shape[2]
    m = np.zeros((W * Cin_, W * Cout), np.float32)
    for w in range(W):
        for dx in range(3):
            wi = w + dx - 1
            if 0 <= wi < W:
                m[wi * Cin_:(wi + 1) * Cin_, w * Cout:(w + 1) * Cout] = w3[dx]
    return m


def pack_params_for_kernel(torch_params, Cin, Ch, W):
    """PyTorch per-cell weights -> fused im2col band matrices (bf16) for the kernel.

    Returns:
      Mx : (3*W*Cin, T*3*W*Ch) bf16  x-side [r|z|cand] for ALL cells, dy-stacked rows
      Mh : (T, 3*W*Ch, 2*W*Ch) bf16  h-side [r|z] per cell
      Mc : (T, 3*W*Ch, W*Ch)   bf16  h-side candidate per cell
      Bv : (1, T*3*W*Ch)       f32   [br|bz|bc] per cell, tiled over W
    """
    mx_cols, mh, mc, bias = [], [], [], []
    for wg, bg, wc, bcv in torch_params:
        wg, bg = np.asarray(wg), np.asarray(bg)
        wc, bcv = np.asarray(wc), np.asarray(bcv)

        def band3(wfull, o_sl, i_sl):
            # OIHW slice -> im2col band: rows stacked by dy (matches cols() order)
            blocks = []
            for dy in range(3):
                w3 = np.transpose(wfull[o_sl, i_sl, dy, :], (2, 1, 0))  # (dx, I, O)
                blocks.append(_band(w3, W))
            return np.concatenate(blocks, axis=0)           # (3*W*I, W*O)

        brx = band3(wg, slice(0, Ch), slice(0, Cin))
        bzx = band3(wg, slice(Ch, 2 * Ch), slice(0, Cin))
        bcx = band3(wc, slice(0, Ch), slice(0, Cin))
        brh = band3(wg, slice(0, Ch), slice(Cin, Cin + Ch))
        bzh = band3(wg, slice(Ch, 2 * Ch), slice(Cin, Cin + Ch))
        bch = band3(wc, slice(0, Ch), slice(Cin, Cin + Ch))

        mx_cols.append(np.concatenate([brx, bzx, bcx], axis=1))   # (3*W*Cin, 3*W*Ch)
        mh.append(np.concatenate([brh, bzh], axis=1))             # (3*W*Ch, 2*W*Ch)
        mc.append(bch)                                            # (3*W*Ch, W*Ch)
        bias.append(np.concatenate(
            [np.tile(bg[:Ch], W), np.tile(bg[Ch:], W), np.tile(bcv, W)]))

    Mx = np.concatenate(mx_cols, axis=1)                          # (3*W*Cin, T*3*W*Ch)
    Bv = np.concatenate(bias)[None, :]                            # (1, T*3*W*Ch)
    return (jnp.asarray(Mx, jnp.bfloat16),
            jnp.asarray(np.stack(mh), jnp.bfloat16),
            jnp.asarray(np.stack(mc), jnp.bfloat16),
            jnp.asarray(Bv, jnp.float32))


# ------------------------ pure-JAX reference (check) ------------------------ #
def _conv2d_same(x, w, b):
    y = lax.conv_general_dilated(x, w, window_strides=(1, 1), padding="SAME",
                                 dimension_numbers=("NCHW", "OIHW", "NCHW"))
    return y + b[None, :, None, None]


def event_gru_reference(state, event, torch_params, Ch):
    x = event[:, 0]                       # event_list[0].squeeze(1) quirk
    h = state
    for wg, bg, wc, bc in torch_params:
        gates = _conv2d_same(jnp.concatenate([x, h], axis=1), wg, bg)
        r = jax.nn.sigmoid(gates[:, :Ch])
        z = jax.nn.sigmoid(gates[:, Ch:])
        n = jnp.tanh(_conv2d_same(jnp.concatenate([x, r * h], axis=1), wc, bc))
        h = (1.0 - z) * h + z * n
    return h


# ----------------------------------- main ----------------------------------- #
if __name__ == "__main__":
    B, Cin, Ch, H, W, T = 2, 4, 8, 16, 16, 3   # input_dim=4, hidden_dim=8, event_length=3
    key = jax.random.PRNGKey(0)
    k1, k2, k3 = jax.random.split(key, 3)
    state_cur = jax.random.normal(k1, (B, Ch, H, W), jnp.float32)
    event = jax.random.normal(k2, (B, T, Cin, H, W), jnp.float32)

    torch_params = init_event_gru_params(k3, T, Cin, Ch)
    packed = pack_params_for_kernel(torch_params, Cin, Ch, W)

    out = event_gru_pallas(state_cur, event, packed, batch_blocks=1)
    out = jax.block_until_ready(out)

    ref = event_gru_reference(state_cur, event, torch_params, Ch)
    assert out.shape == ref.shape == (B, Ch, H, W)
    max_err = float(jnp.max(jnp.abs(out - ref)))
    # bf16 matmul operands vs. f32 reference -> tolerance loosened (sigmoid/tanh-bounded
    # errors stay well below this; layout/packing bugs would be O(0.1-1)).
    if not max_err < 5e-2:
        raise RuntimeError(f"kernel/reference mismatch, max abs err = {max_err}")
    print("KERNEL_OK")
</pallas_src>

<mosaic_0001>
module attributes {stable_mosaic.version = 11 : i64} {
  func.func @_event_gru_kernel(%arg0: i32, %arg1: memref<2x16x128xf32, #tpu.memory_space<vmem>>, %arg2: memref<2x18x64xf32, #tpu.memory_space<vmem>>, %arg3: memref<192x1152xbf16, #tpu.memory_space<vmem>>, %arg4: memref<3x384x256xbf16, #tpu.memory_space<vmem>>, %arg5: memref<3x384x128xbf16, #tpu.memory_space<vmem>>, %arg6: memref<1x1152xf32, #tpu.memory_space<vmem>>, %arg7: memref<2x16x128xf32, #tpu.memory_space<vmem>>, %arg8: memref<2x18x128xf32, #tpu.memory_space<vmem>>, %arg9: memref<32x1152xf32, #tpu.memory_space<vmem>>) attributes {dimension_semantics = [#tpu.dimension_semantics<parallel>], iteration_bounds = array<i64: 1>, scalar_prefetch = 0 : i64, scratch_operands = 2 : i64, tpu.core_type = #tpu.core_type<tc>, window_params = [{transform_indices = @transform_0, window_bounds = array<i64: 2, 16, 128>}, {transform_indices = @transform_1, window_bounds = array<i64: 2, 18, 64>}, {pipeline_mode = #tpu.pipeline_mode<synchronous>, transform_indices = @transform_2, window_bounds = array<i64: 192, 1152>}, {pipeline_mode = #tpu.pipeline_mode<synchronous>, transform_indices = @transform_3, window_bounds = array<i64: 3, 384, 256>}, {pipeline_mode = #tpu.pipeline_mode<synchronous>, transform_indices = @transform_4, window_bounds = array<i64: 3, 384, 128>}, {pipeline_mode = #tpu.pipeline_mode<synchronous>, transform_indices = @transform_5, window_bounds = array<i64: 1, 1152>}, {transform_indices = @transform_6, window_bounds = array<i64: 2, 16, 128>}]} {
    %c0 = arith.constant 0 : index
    %c0_0 = arith.constant 0 : index
    %c0_1 = arith.constant 0 : index
    %0 = vector.load %arg2[%c0, %c0_0, %c0_1] : memref<2x18x64xf32, #tpu.memory_space<vmem>>, vector<2x16x64xf32>
    %c0_2 = arith.constant 0 : index
    %c1 = arith.constant 1 : index
    %c0_3 = arith.constant 0 : index
    %1 = vector.load %arg2[%c0_2, %c1, %c0_3] : memref<2x18x64xf32, #tpu.memory_space<vmem>>, vector<2x16x64xf32>
    %c0_4 = arith.constant 0 : index
    %c2 = arith.constant 2 : index
    %c0_5 = arith.constant 0 : index
    %2 = vector.load %arg2[%c0_4, %c2, %c0_5] : memref<2x18x64xf32, #tpu.memory_space<vmem>>, vector<2x16x64xf32>
    %3 = tpu.concatenate %0, %1, %2 in 2 : vector<2x16x64xf32>, vector<2x16x64xf32>, vector<2x16x64xf32> -> vector<2x16x192xf32>
    %4 = vector.shape_cast %3 : vector<2x16x192xf32> to vector<32x192xf32>
    %5 = arith.truncf %4 : vector<32x192xf32> to vector<32x192xbf16>
    %c0_6 = arith.constant 0 : index
    %c0_7 = arith.constant 0 : index
    %6 = vector.load %arg3[%c0_6, %c0_7] : memref<192x1152xbf16, #tpu.memory_space<vmem>>, vector<192x1152xbf16>
    %cst = arith.constant dense<0.000000e+00> : vector<32x1152xf32>
    %7 = tpu.matmul %5, %6, %cst {dimension_numbers = #tpu.dot_dimension_numbers<[1], [0], [0], [1], [0, 0, 1, 1], [], []>} : vector<32x192xbf16>, vector<192x1152xbf16>, vector<32x1152xf32> -> vector<32x1152xf32>
    %c0_8 = arith.constant 0 : index
    %c0_9 = arith.constant 0 : index
    %8 = vector.load %arg6[%c0_8, %c0_9] : memref<1x1152xf32, #tpu.memory_space<vmem>>, vector<1x1152xf32>
    %9 = vector.broadcast %8 : vector<1x1152xf32> to vector<32x1152xf32>
    %10 = arith.addf %7, %9 : vector<32x1152xf32>
    %c0_10 = arith.constant 0 : index
    %c0_11 = arith.constant 0 : index
    %11 = vector.load %arg9[%c0_10, %c0_11] : memref<32x1152xf32, #tpu.memory_space<vmem>>, vector<32x1152xf32>
    tpu.vector_store %arg9[%c0_10, %c0_11], %10 {strides = array<i32>} : memref<32x1152xf32, #tpu.memory_space<vmem>>, vector<32x1152xf32>,
    %cst_12 = arith.constant 0.000000e+00 : f32
    %12 = vector.broadcast %cst_12 : f32 to vector<2x1x128xf32>
    %c0_13 = arith.constant 0 : index
    %c0_14 = arith.constant 0 : index
    %c0_15 = arith.constant 0 : index
    %13 = vector.load %arg8[%c0_13, %c0_14, %c0_15] : memref<2x18x128xf32, #tpu.memory_space<vmem>>, vector<2x1x128xf32>
    tpu.vector_store %arg8[%c0_13, %c0_14, %c0_15], %12 {strides = array<i32>} : memref<2x18x128xf32, #tpu.memory_space<vmem>>, vector<2x1x128xf32>,
    %cst_16 = arith.constant 0.000000e+00 : f32
    %14 = vector.broadcast %cst_16 : f32 to vector<2x1x128xf32>
    %c0_17 = arith.constant 0 : index
    %c17 = arith.constant 17 : index
    %c0_18 = arith.constant 0 : index
    %15 = vector.load %arg8[%c0_17, %c17, %c0_18] : memref<2x18x128xf32, #tpu.memory_space<vmem>>, vector<2x1x128xf32>
    tpu.vector_store %arg8[%c0_17, %c17, %c0_18], %14 {strides = array<i32>} : memref<2x18x128xf32, #tpu.memory_space<vmem>>, vector<2x1x128xf32>,
    %c0_19 = arith.constant 0 : index
    %c0_20 = arith.constant 0 : index
    %c0_21 = arith.constant 0 : index
    %16 = vector.load %arg1[%c0_19, %c0_20, %c0_21] : memref<2x16x128xf32, #tpu.memory_space<vmem>>, vector<2x16x128xf32>
    %c0_22 = arith.constant 0 : index
    %c1_23 = arith.constant 1 : index
    %c0_24 = arith.constant 0 : index
    %17 = vector.load %arg8[%c0_22, %c1_23, %c0_24] : memref<2x18x128xf32, #tpu.memory_space<vmem>>, vector<2x16x128xf32>
    tpu.vector_store %arg8[%c0_22, %c1_23, %c0_24], %16 {strides = array<i32>} : memref<2x18x128xf32, #tpu.memory_space<vmem>>, vector<2x16x128xf32>,
    %c0_25 = arith.constant 0 : index
    %c0_26 = arith.constant 0 : index
    %c0_27 = arith.constant 0 : index
    %18 = vector.load %arg1[%c0_25, %c0_26, %c0_27] : memref<2x16x128xf32, #tpu.memory_space<vmem>>, vector<2x16x128xf32>
    %19 = vector.shape_cast %18 : vector<2x16x128xf32> to vector<32x128xf32>
    %c0_28 = arith.constant 0 : index
    %c0_29 = arith.constant 0 : index
    %20 = vector.load %arg9[%c0_28, %c0_29] : memref<32x1152xf32, #tpu.memory_space<vmem>>, vector<32x384xf32>
    %c0_30 = arith.constant 0 : index
    %c0_31 = arith.constant 0 : index
    %c0_32 = arith.constant 0 : index
    %21 = vector.load %arg8[%c0_30, %c0_31, %c0_32] : memref<2x18x128xf32, #tpu.memory_space<vmem>>, vector<2x16x128xf32>
    %c0_33 = arith.constant 0 : index
    %c1_34 = arith.constant 1 : index
    %c0_35 = arith.constant 0 : index
    %22 = vector.load %arg8[%c0_33, %c1_34, %c0_35] : memref<2x18x128xf32, #tpu.memory_space<vmem>>, vector<2x16x128xf32>
    %c0_36 = arith.constant 0 : index
    %c2_37 = arith.constant 2 : index
    %c0_38 = arith.constant 0 : index
    %23 = vector.load %arg8[%c0_36, %c2_37, %c0_38] : memref<2x18x128xf32, #tpu.memory_space<vmem>>, vector<2x16x128xf32>
    %24 = tpu.concatenate %21, %22, %23 in 2 : vector<2x16x128xf32>, vector<2x16x128xf32>, vector<2x16x128xf32> -> vector<2x16x384xf32>
    %25 = vector.shape_cast %24 : vector<2x16x384xf32> to vector<32x384xf32>
    %26 = arith.truncf %25 : vector<32x384xf32> to vector<32x384xbf16>
    %c0_39 = arith.constant 0 : index
    %c0_40 = arith.constant 0 : index
    %c0_41 = arith.constant 0 : index
    %27 = vector.load %arg4[%c0_39, %c0_40, %c0_41] : memref<3x384x256xbf16, #tpu.memory_space<vmem>>, vector<1x384x256xbf16>
    %28 = vector.shape_cast %27 : vector<1x384x256xbf16> to vector<384x256xbf16>
    %cst_42 = arith.constant dense<0.000000e+00> : vector<32x256xf32>
    %29 = tpu.matmul %26, %28, %cst_42 {dimension_numbers = #tpu.dot_dimension_numbers<[1], [0], [0], [1], [0, 0, 1, 1], [], []>} : vector<32x384xbf16>, vector<384x256xbf16>, vector<32x256xf32> -> vector<32x256xf32>
    %30 = vector.extract_strided_slice %20 {offsets = [0, 0], sizes = [32, 128], strides = [1, 1]} : vector<32x384xf32> to vector<32x128xf32>
    %31 = vector.extract_strided_slice %29 {offsets = [0, 0], sizes = [32, 128], strides = [1, 1]} : vector<32x256xf32> to vector<32x128xf32>
    %32 = arith.addf %30, %31 : vector<32x128xf32>
    %33 = arith.negf %32 : vector<32x128xf32>
    %34 = math.exp %33 : vector<32x128xf32>
    %cst_43 = arith.constant 1.000000e+00 : f32
    %35 = vector.broadcast %cst_43 : f32 to vector<32x128xf32>
    %36 = arith.addf %35, %34 : vector<32x128xf32>
    %37 = arith.divf %35, %36 : vector<32x128xf32>
    %38 = vector.extract_strided_slice %20 {offsets = [0, 128], sizes = [32, 128], strides = [1, 1]} : vector<32x384xf32> to vector<32x128xf32>
    %39 = vector.extract_strided_slice %29 {offsets = [0, 128], sizes = [32, 128], strides = [1, 1]} : vector<32x256xf32> to vector<32x128xf32>
    %40 = arith.addf %38, %39 : vector<32x128xf32>
    %41 = arith.negf %40 : vector<32x128xf32>
    %42 = math.exp %41 : vector<32x128xf32>
    %cst_44 = arith.constant 1.000000e+00 : f32
    %43 = vector.broadcast %cst_44 : f32 to vector<32x128xf32>
    %44 = arith.addf %43, %42 : vector<32x128xf32>
    %45 = arith.divf %43, %44 : vector<32x128xf32>
    %46 = arith.mulf %37, %19 : vector<32x128xf32>
    %47 = vector.shape_cast %46 : vector<32x128xf32> to vector<2x16x128xf32>
    %c0_45 = arith.constant 0 : index
    %c1_46 = arith.constant 1 : index
    %c0_47 = arith.constant 0 : index
    %48 = vector.load %arg8[%c0_45, %c1_46, %c0_47] : memref<2x18x128xf32, #tpu.memory_space<vmem>>, vector<2x16x128xf32>
    tpu.vector_store %arg8[%c0_45, %c1_46, %c0_47], %47 {strides = array<i32>} : memref<2x18x128xf32, #tpu.memory_space<vmem>>, vector<2x16x128xf32>,
    %c0_48 = arith.constant 0 : index
    %c0_49 = arith.constant 0 : index
    %c0_50 = arith.constant 0 : index
    %49 = vector.load %arg8[%c0_48, %c0_49, %c0_50] : memref<2x18x128xf32, #tpu.memory_space<vmem>>, vector<2x16x128xf32>
    %c0_51 = arith.constant 0 : index
    %c1_52 = arith.constant 1 : index
    %c0_53 = arith.constant 0 : index
    %50 = vector.load %arg8[%c0_51, %c1_52, %c0_53] : memref<2x18x128xf32, #tpu.memory_space<vmem>>, vector<2x16x128xf32>
    %c0_54 = arith.constant 0 : index
    %c2_55 = arith.constant 2 : index
    %c0_56 = arith.constant 0 : index
    %51 = vector.load %arg8[%c0_54, %c2_55, %c0_56] : memref<2x18x128xf32, #tpu.memory_space<vmem>>, vector<2x16x128xf32>
    %52 = tpu.concatenate %49, %50, %51 in 2 : vector<2x16x128xf32>, vector<2x16x128xf32>, vector<2x16x128xf32> -> vector<2x16x384xf32>
    %53 = vector.shape_cast %52 : vector<2x16x384xf32> to vector<32x384xf32>
    %54 = arith.truncf %53 : vector<32x384xf32> to vector<32x384xbf16>
    %c0_57 = arith.constant 0 : index
    %c0_58 = arith.constant 0 : index
    %c0_59 = arith.constant 0 : index
    %55 = vector.load %arg5[%c0_57, %c0_58, %c0_59] : memref<3x384x128xbf16, #tpu.memory_space<vmem>>, vector<1x384x128xbf16>
    %56 = vector.shape_cast %55 : vector<1x384x128xbf16> to vector<384x128xbf16>
    %cst_60 = arith.constant dense<0.000000e+00> : vector<32x128xf32>
    %57 = tpu.matmul %54, %56, %cst_60 {dimension_numbers = #tpu.dot_dimension_numbers<[1], [0], [0], [1], [0, 0, 1, 1], [], []>} : vector<32x384xbf16>, vector<384x128xbf16>, vector<32x128xf32> -> vector<32x128xf32>
    %58 = vector.extract_strided_slice %20 {offsets = [0, 256], sizes = [32, 128], strides = [1, 1]} : vector<32x384xf32> to vector<32x128xf32>
    %59 = arith.addf %58, %57 : vector<32x128xf32>
    %60 = math.tanh %59 : vector<32x128xf32>
    %cst_61 = arith.constant 1.000000e+00 : f32
    %61 = vector.broadcast %cst_61 : f32 to vector<32x128xf32>
    %62 = arith.subf %61, %45 : vector<32x128xf32>
    %63 = arith.mulf %62, %19 : vector<32x128xf32>
    %64 = arith.mulf %45, %60 : vector<32x128xf32>
    %65 = arith.addf %63, %64 : vector<32x128xf32>
    %66 = vector.shape_cast %65 : vector<32x128xf32> to vector<2x16x128xf32>
    %c0_62 = arith.constant 0 : index
    %c1_63 = arith.constant 1 : index
    %c0_64 = arith.constant 0 : index
    %67 = vector.load %arg8[%c0_62, %c1_63, %c0_64] : memref<2x18x128xf32, #tpu.memory_space<vmem>>, vector<2x16x128xf32>
    tpu.vector_store %arg8[%c0_62, %c1_63, %c0_64], %66 {strides = array<i32>} : memref<2x18x128xf32, #tpu.memory_space<vmem>>, vector<2x16x128xf32>,
    %c0_65 = arith.constant 0 : index
    %c384 = arith.constant 384 : index
    %68 = vector.load %arg9[%c0_65, %c384] : memref<32x1152xf32, #tpu.memory_space<vmem>>, vector<32x384xf32>
    %c0_66 = arith.constant 0 : index
    %c0_67 = arith.constant 0 : index
    %c0_68 = arith.constant 0 : index
    %69 = vector.load %arg8[%c0_66, %c0_67, %c0_68] : memref<2x18x128xf32, #tpu.memory_space<vmem>>, vector<2x16x128xf32>
    %c0_69 = arith.constant 0 : index
    %c1_70 = arith.constant 1 : index
    %c0_71 = arith.constant 0 : index
    %70 = vector.load %arg8[%c0_69, %c1_70, %c0_71] : memref<2x18x128xf32, #tpu.memory_space<vmem>>, vector<2x16x128xf32>
    %c0_72 = arith.constant 0 : index
    %c2_73 = arith.constant 2 : index
    %c0_74 = arith.constant 0 : index
    %71 = vector.load %arg8[%c0_72, %c2_73, %c0_74] : memref<2x18x128xf32, #tpu.memory_space<vmem>>, vector<2x16x128xf32>
    %72 = tpu.concatenate %69, %70, %71 in 2 : vector<2x16x128xf32>, vector<2x16x128xf32>, vector<2x16x128xf32> -> vector<2x16x384xf32>
    %73 = vector.shape_cast %72 : vector<2x16x384xf32> to vector<32x384xf32>
    %74 = arith.truncf %73 : vector<32x384xf32> to vector<32x384xbf16>
    %c1_75 = arith.constant 1 : index
    %c0_76 = arith.constant 0 : index
    %c0_77 = arith.constant 0 : index
    %75 = vector.load %arg4[%c1_75, %c0_76, %c0_77] : memref<3x384x256xbf16, #tpu.memory_space<vmem>>, vector<1x384x256xbf16>
    %76 = vector.shape_cast %75 : vector<1x384x256xbf16> to vector<384x256xbf16>
    %cst_78 = arith.constant dense<0.000000e+00> : vector<32x256xf32>
    %77 = tpu.matmul %74, %76, %cst_78 {dimension_numbers = #tpu.dot_dimension_numbers<[1], [0], [0], [1], [0, 0, 1, 1], [], []>} : vector<32x384xbf16>, vector<384x256xbf16>, vector<32x256xf32> -> vector<32x256xf32>
    %78 = vector.extract_strided_slice %68 {offsets = [0, 0], sizes = [32, 128], strides = [1, 1]} : vector<32x384xf32> to vector<32x128xf32>
    %79 = vector.extract_strided_slice %77 {offsets = [0, 0], sizes = [32, 128], strides = [1, 1]} : vector<32x256xf32> to vector<32x128xf32>
    %80 = arith.addf %78, %79 : vector<32x128xf32>
    %81 = arith.negf %80 : vector<32x128xf32>
    %82 = math.exp %81 : vector<32x128xf32>
    %cst_79 = arith.constant 1.000000e+00 : f32
    %83 = vector.broadcast %cst_79 : f32 to vector<32x128xf32>
    %84 = arith.addf %83, %82 : vector<32x128xf32>
    %85 = arith.divf %83, %84 : vector<32x128xf32>
    %86 = vector.extract_strided_slice %68 {offsets = [0, 128], sizes = [32, 128], strides = [1, 1]} : vector<32x384xf32> to vector<32x128xf32>
    %87 = vector.extract_strided_slice %77 {offsets = [0, 128], sizes = [32, 128], strides = [1, 1]} : vector<32x256xf32> to vector<32x128xf32>
    %88 = arith.addf %86, %87 : vector<32x128xf32>
    %89 = arith.negf %88 : vector<32x128xf32>
    %90 = math.exp %89 : vector<32x128xf32>
    %cst_80 = arith.constant 1.000000e+00 : f32
    %91 = vector.broadcast %cst_80 : f32 to vector<32x128xf32>
    %92 = arith.addf %91, %90 : vector<32x128xf32>
    %93 = arith.divf %91, %92 : vector<32x128xf32>
    %94 = arith.mulf %85, %65 : vector<32x128xf32>
    %95 = vector.shape_cast %94 : vector<32x128xf32> to vector<2x16x128xf32>
    %c0_81 = arith.constant 0 : index
    %c1_82 = arith.constant 1 : index
    %c0_83 = arith.constant 0 : index
    %96 = vector.load %arg8[%c0_81, %c1_82, %c0_83] : memref<2x18x128xf32, #tpu.memory_space<vmem>>, vector<2x16x128xf32>
    tpu.vector_store %arg8[%c0_81, %c1_82, %c0_83], %95 {strides = array<i32>} : memref<2x18x128xf32, #tpu.memory_space<vmem>>, vector<2x16x128xf32>,
    %c0_84 = arith.constant 0 : index
    %c0_85 = arith.constant 0 : index
    %c0_86 = arith.constant 0 : index
    %97 = vector.load %arg8[%c0_84, %c0_85, %c0_86] : memref<2x18x128xf32, #tpu.memory_space<vmem>>, vector<2x16x128xf32>
    %c0_87 = arith.constant 0 : index
    %c1_88 = arith.constant 1 : index
    %c0_89 = arith.constant 0 : index
    %98 = vector.load %arg8[%c0_87, %c1_88, %c0_89] : memref<2x18x128xf32, #tpu.memory_space<vmem>>, vector<2x16x128xf32>
    %c0_90 = arith.constant 0 : index
    %c2_91 = arith.constant 2 : index
    %c0_92 = arith.constant 0 : index
    %99 = vector.load %arg8[%c0_90, %c2_91, %c0_92] : memref<2x18x128xf32, #tpu.memory_space<vmem>>, vector<2x16x128xf32>
    %100 = tpu.concatenate %97, %98, %99 in 2 : vector<2x16x128xf32>, vector<2x16x128xf32>, vector<2x16x128xf32> -> vector<2x16x384xf32>
    %101 = vector.shape_cast %100 : vector<2x16x384xf32> to vector<32x384xf32>
    %102 = arith.truncf %101 : vector<32x384xf32> to vector<32x384xbf16>
    %c1_93 = arith.constant 1 : index
    %c0_94 = arith.constant 0 : index
    %c0_95 = arith.constant 0 : index
    %103 = vector.load %arg5[%c1_93, %c0_94, %c0_95] : memref<3x384x128xbf16, #tpu.memory_space<vmem>>, vector<1x384x128xbf16>
    %104 = vector.shape_cast %103 : vector<1x384x128xbf16> to vector<384x128xbf16>
    %cst_96 = arith.constant dense<0.000000e+00> : vector<32x128xf32>
    %105 = tpu.matmul %102, %104, %cst_96 {dimension_numbers = #tpu.dot_dimension_numbers<[1], [0], [0], [1], [0, 0, 1, 1], [], []>} : vector<32x384xbf16>, vector<384x128xbf16>, vector<32x128xf32> -> vector<32x128xf32>
    %106 = vector.extract_strided_slice %68 {offsets = [0, 256], sizes = [32, 128], strides = [1, 1]} : vector<32x384xf32> to vector<32x128xf32>
    %107 = arith.addf %106, %105 : vector<32x128xf32>
    %108 = math.tanh %107 : vector<32x128xf32>
    %cst_97 = arith.constant 1.000000e+00 : f32
    %109 = vector.broadcast %cst_97 : f32 to vector<32x128xf32>
    %110 = arith.subf %109, %93 : vector<32x128xf32>
    %111 = arith.mulf %110, %65 : vector<32x128xf32>
    %112 = arith.mulf %93, %108 : vector<32x128xf32>
    %113 = arith.addf %111, %112 : vector<32x128xf32>
    %114 = vector.shape_cast %113 : vector<32x128xf32> to vector<2x16x128xf32>
    %c0_98 = arith.constant 0 : index
    %c1_99 = arith.constant 1 : index
    %c0_100 = arith.constant 0 : index
    %115 = vector.load %arg8[%c0_98, %c1_99, %c0_100] : memref<2x18x128xf32, #tpu.memory_space<vmem>>, vector<2x16x128xf32>
    tpu.vector_store %arg8[%c0_98, %c1_99, %c0_100], %114 {strides = array<i32>} : memref<2x18x128xf32, #tpu.memory_space<vmem>>, vector<2x16x128xf32>,
    %c0_101 = arith.constant 0 : index
    %c768 = arith.constant 768 : index
    %116 = vector.load %arg9[%c0_101, %c768] : memref<32x1152xf32, #tpu.memory_space<vmem>>, vector<32x384xf32>
    %c0_102 = arith.constant 0 : index
    %c0_103 = arith.constant 0 : index
    %c0_104 = arith.constant 0 : index
    %117 = vector.load %arg8[%c0_102, %c0_103, %c0_104] : memref<2x18x128xf32, #tpu.memory_space<vmem>>, vector<2x16x128xf32>
    %c0_105 = arith.constant 0 : index
    %c1_106 = arith.constant 1 : index
    %c0_107 = arith.constant 0 : index
    %118 = vector.load %arg8[%c0_105, %c1_106, %c0_107] : memref<2x18x128xf32, #tpu.memory_space<vmem>>, vector<2x16x128xf32>
    %c0_108 = arith.constant 0 : index
    %c2_109 = arith.constant 2 : index
    %c0_110 = arith.constant 0 : index
    %119 = vector.load %arg8[%c0_108, %c2_109, %c0_110] : memref<2x18x128xf32, #tpu.memory_space<vmem>>, vector<2x16x128xf32>
    %120 = tpu.concatenate %117, %118, %119 in 2 : vector<2x16x128xf32>, vector<2x16x128xf32>, vector<2x16x128xf32> -> vector<2x16x384xf32>
    %121 = vector.shape_cast %120 : vector<2x16x384xf32> to vector<32x384xf32>
    %122 = arith.truncf %121 : vector<32x384xf32> to vector<32x384xbf16>
    %c2_111 = arith.constant 2 : index
    %c0_112 = arith.constant 0 : index
    %c0_113 = arith.constant 0 : index
    %123 = vector.load %arg4[%c2_111, %c0_112, %c0_113] : memref<3x384x256xbf16, #tpu.memory_space<vmem>>, vector<1x384x256xbf16>
    %124 = vector.shape_cast %123 : vector<1x384x256xbf16> to vector<384x256xbf16>
    %cst_114 = arith.constant dense<0.000000e+00> : vector<32x256xf32>
    %125 = tpu.matmul %122, %124, %cst_114 {dimension_numbers = #tpu.dot_dimension_numbers<[1], [0], [0], [1], [0, 0, 1, 1], [], []>} : vector<32x384xbf16>, vector<384x256xbf16>, vector<32x256xf32> -> vector<32x256xf32>
    %126 = vector.extract_strided_slice %116 {offsets = [0, 0], sizes = [32, 128], strides = [1, 1]} : vector<32x384xf32> to vector<32x128xf32>
    %127 = vector.extract_strided_slice %125 {offsets = [0, 0], sizes = [32, 128], strides = [1, 1]} : vector<32x256xf32> to vector<32x128xf32>
    %128 = arith.addf %126, %127 : vector<32x128xf32>
    %129 = arith.negf %128 : vector<32x128xf32>
    %130 = math.exp %129 : vector<32x128xf32>
    %cst_115 = arith.constant 1.000000e+00 : f32
    %131 = vector.broadcast %cst_115 : f32 to vector<32x128xf32>
    %132 = arith.addf %131, %130 : vector<32x128xf32>
    %133 = arith.divf %131, %132 : vector<32x128xf32>
    %134 = vector.extract_strided_slice %116 {offsets = [0, 128], sizes = [32, 128], strides = [1, 1]} : vector<32x384xf32> to vector<32x128xf32>
    %135 = vector.extract_strided_slice %125 {offsets = [0, 128], sizes = [32, 128], strides = [1, 1]} : vector<32x256xf32> to vector<32x128xf32>
    %136 = arith.addf %134, %135 : vector<32x128xf32>
    %137 = arith.negf %136 : vector<32x128xf32>
    %138 = math.exp %137 : vector<32x128xf32>
    %cst_116 = arith.constant 1.000000e+00 : f32
    %139 = vector.broadcast %cst_116 : f32 to vector<32x128xf32>
    %140 = arith.addf %139, %138 : vector<32x128xf32>
    %141 = arith.divf %139, %140 : vector<32x128xf32>
    %142 = arith.mulf %133, %113 : vector<32x128xf32>
    %143 = vector.shape_cast %142 : vector<32x128xf32> to vector<2x16x128xf32>
    %c0_117 = arith.constant 0 : index
    %c1_118 = arith.constant 1 : index
    %c0_119 = arith.constant 0 : index
    %144 = vector.load %arg8[%c0_117, %c1_118, %c0_119] : memref<2x18x128xf32, #tpu.memory_space<vmem>>, vector<2x16x128xf32>
    tpu.vector_store %arg8[%c0_117, %c1_118, %c0_119], %143 {strides = array<i32>} : memref<2x18x128xf32, #tpu.memory_space<vmem>>, vector<2x16x128xf32>,
    %c0_120 = arith.constant 0 : index
    %c0_121 = arith.constant 0 : index
    %c0_122 = arith.constant 0 : index
    %145 = vector.load %arg8[%c0_120, %c0_121, %c0_122] : memref<2x18x128xf32, #tpu.memory_space<vmem>>, vector<2x16x128xf32>
    %c0_123 = arith.constant 0 : index
    %c1_124 = arith.constant 1 : index
    %c0_125 = arith.constant 0 : index
    %146 = vector.load %arg8[%c0_123, %c1_124, %c0_125] : memref<2x18x128xf32, #tpu.memory_space<vmem>>, vector<2x16x128xf32>
    %c0_126 = arith.constant 0 : index
    %c2_127 = arith.constant 2 : index
    %c0_128 = arith.constant 0 : index
    %147 = vector.load %arg8[%c0_126, %c2_127, %c0_128] : memref<2x18x128xf32, #tpu.memory_space<vmem>>, vector<2x16x128xf32>
    %148 = tpu.concatenate %145, %146, %147 in 2 : vector<2x16x128xf32>, vector<2x16x128xf32>, vector<2x16x128xf32> -> vector<2x16x384xf32>
    %149 = vector.shape_cast %148 : vector<2x16x384xf32> to vector<32x384xf32>
    %150 = arith.truncf %149 : vector<32x384xf32> to vector<32x384xbf16>
    %c2_129 = arith.constant 2 : index
    %c0_130 = arith.constant 0 : index
    %c0_131 = arith.constant 0 : index
    %151 = vector.load %arg5[%c2_129, %c0_130, %c0_131] : memref<3x384x128xbf16, #tpu.memory_space<vmem>>, vector<1x384x128xbf16>
    %152 = vector.shape_cast %151 : vector<1x384x128xbf16> to vector<384x128xbf16>
    %cst_132 = arith.constant dense<0.000000e+00> : vector<32x128xf32>
    %153 = tpu.matmul %150, %152, %cst_132 {dimension_numbers = #tpu.dot_dimension_numbers<[1], [0], [0], [1], [0, 0, 1, 1], [], []>} : vector<32x384xbf16>, vector<384x128xbf16>, vector<32x128xf32> -> vector<32x128xf32>
    %154 = vector.extract_strided_slice %116 {offsets = [0, 256], sizes = [32, 128], strides = [1, 1]} : vector<32x384xf32> to vector<32x128xf32>
    %155 = arith.addf %154, %153 : vector<32x128xf32>
    %156 = math.tanh %155 : vector<32x128xf32>
    %cst_133 = arith.constant 1.000000e+00 : f32
    %157 = vector.broadcast %cst_133 : f32 to vector<32x128xf32>
    %158 = arith.subf %157, %141 : vector<32x128xf32>
    %159 = arith.mulf %158, %113 : vector<32x128xf32>
    %160 = arith.mulf %141, %156 : vector<32x128xf32>
    %161 = arith.addf %159, %160 : vector<32x128xf32>
    %162 = vector.shape_cast %161 : vector<32x128xf32> to vector<2x16x128xf32>
    %c0_134 = arith.constant 0 : index
    %c0_135 = arith.constant 0 : index
    %c0_136 = arith.constant 0 : index
    %163 = vector.load %arg7[%c0_134, %c0_135, %c0_136] : memref<2x16x128xf32, #tpu.memory_space<vmem>>, vector<2x16x128xf32>
    tpu.vector_store %arg7[%c0_134, %c0_135, %c0_136], %162 {strides = array<i32>} : memref<2x16x128xf32, #tpu.memory_space<vmem>>, vector<2x16x128xf32>,
    return
  }
  func.func @transform_0(%arg0: i32) -> (i32, i32, i32) {
    %c0_i32 = arith.constant 0 : i32
    %c0_i32_0 = arith.constant 0 : i32
    %c0_i32_1 = arith.constant 0 : i32
    return %arg0, %c0_i32, %c0_i32_0 : i32, i32, i32
  }
  func.func @transform_1(%arg0: i32) -> (i32, i32, i32) {
    %c0_i32 = arith.constant 0 : i32
    %c0_i32_0 = arith.constant 0 : i32
    %c0_i32_1 = arith.constant 0 : i32
    return %arg0, %c0_i32, %c0_i32_0 : i32, i32, i32
  }
  func.func @transform_2(%arg0: i32) -> (i32, i32) {
    %c0_i32 = arith.constant 0 : i32
    %c0_i32_0 = arith.constant 0 : i32
    %c0_i32_1 = arith.constant 0 : i32
    return %c0_i32, %c0_i32_0 : i32, i32
  }
  func.func @transform_3(%arg0: i32) -> (i32, i32, i32) {
    %c0_i32 = arith.constant 0 : i32
    %c0_i32_0 = arith.constant 0 : i32
    %c0_i32_1 = arith.constant 0 : i32
    %c0_i32_2 = arith.constant 0 : i32
    return %c0_i32, %c0_i32_0, %c0_i32_1 : i32, i32, i32
  }
  func.func @transform_4(%arg0: i32) -> (i32, i32, i32) {
    %c0_i32 = arith.constant 0 : i32
    %c0_i32_0 = arith.constant 0 : i32
    %c0_i32_1 = arith.constant 0 : i32
    %c0_i32_2 = arith.constant 0 : i32
    return %c0_i32, %c0_i32_0, %c0_i32_1 : i32, i32, i32
  }
  func.func @transform_5(%arg0: i32) -> (i32, i32) {
    %c0_i32 = arith.constant 0 : i32
    %c0_i32_0 = arith.constant 0 : i32
    %c0_i32_1 = arith.constant 0 : i32
    return %c0_i32, %c0_i32_0 : i32, i32
  }
  func.func @transform_6(%arg0: i32) -> (i32, i32, i32) {
    %c0_i32 = arith.constant 0 : i32
    %c0_i32_0 = arith.constant 0 : i32
    %c0_i32_1 = arith.constant 0 : i32
    return %arg0, %c0_i32, %c0_i32_0 : i32, i32, i32
  }
}

</mosaic_0001>

<bundles_post_ra>
// kernel: tpu_custom_call.1
= control target key start
LH: loop header
LB: loop body
LE: loop exit
PB: predicated region body
PF: predicated region fallthrough
CT: control target
= control target key end

     0   :  { %11 = vsyncpa [#allocation5], 0  ;;  %s5315_s0 = inlined_call_operand.vmem [shape: f32[2,16,128], index: 0, kind: input, shape index: {}]   ;;  %s5316_s1 = inlined_call_operand.vmem [shape: f32[2,18,64], index: 1, kind: input, shape index: {}]   ;;  %s5317_s2 = inlined_call_operand.hbm [shape: bf16[192,1152], index: 2, kind: input, shape index: {}]   ;;  %s5318_s3 = inlined_call_operand.hbm [shape: bf16[3,384,256], index: 3, kind: input, shape index: {}]   ;;  %s5319_s4 = inlined_call_operand.hbm [shape: bf16[3,384,128], index: 4, kind: input, shape index: {}]   ;;  %s5320_s5 = inlined_call_operand.vmem [shape: f32[1,1152], index: 5, kind: input, shape index: {}]   ;;  %s5321_s6 = inlined_call_operand.hbm [shape: f32[2,16,128], index: 6, kind: output, shape index: {}]  }
   0x1   :  { %12 = vsyncpa [#allocation8], 0 }
   0x2   :  { %13 = vsyncpa [#allocation6], 0  ;;  %s4907_s21 = smov [#allocation7]   ;;  %s4813_s25 = scalar_lea.hbm %s5318_s3, 18432 }
   0x3   :  { %s35_s22 = sshll.u32 %s4907_s21, 4  ;;  %p4814_p0 = scmp.ne.s32.totalorder %s5318_s3, %s4813_s25  ;;  %s36_s22 = int_to_ptr.vmem [resolvable:$true] %s35_s22 }
   0x4   :  { %p4817_p1 = scmp.lt.u32.totalorder %s4813_s25, %s5318_s3 }
   0x6   :  { %p4819_p2 = pnand %p4817_p1, %p4814_p0 }
   0x8   :  { %4822 = shalt.err (!%p4819_p2)
}
   0x9   :  { %s4823_s30 = scalar_lea.vmem %s36_s22, 18432  ;;  %p4828_p4 = scmp.lt.s32.totalorder %s36_s22, %s36_s22 }
   0xa   :  { %p4824_p3 = scmp.ne.s32.totalorder %s36_s22, %s4823_s30  ;;  %p4829_p5 = scmp.lt.s32.totalorder %s4823_s30, %s4823_s30 }
   0xc   :  { %p4830_p6 = por %p4829_p5, %p4828_p4 }
   0xe   :  { %p4831_p7 = pnand %p4830_p6, %p4824_p3 }
  0x10   :  { %4834 = shalt.err (!%p4831_p7)
}
  0x11   :  { %s4908_s7 = smov 128   ;;  %s4909_s8 = smov 8  }
  0x12   :  { %41 = dma.hbm_to_vmem [thread:$0]  %s5318_s3, 18432, %s36_s22, [#allocation8], %s4908_s7, %s4908_s7, %s4909_s8  }
  0x13   :  { %s4910_s11 = smov [#allocation4]   ;;  %s4835_s15 = scalar_lea.hbm %s5317_s2, 13824 }
  0x14   :  { %s23_s12 = sshll.u32 %s4910_s11, 4  ;;  %p4836_p8 = scmp.ne.s32.totalorder %s5317_s2, %s4835_s15  ;;  %s24_s12 = int_to_ptr.vmem [resolvable:$true] %s23_s12 }
  0x15   :  { %p4839_p9 = scmp.lt.u32.totalorder %s4835_s15, %s5317_s2 }
  0x17   :  { %p4841_p10 = pnand %p4839_p9, %p4836_p8 }
  0x19   :  { %4844 = shalt.err (!%p4841_p10)
}
  0x1a   :  { %s4845_s20 = scalar_lea.vmem %s24_s12, 13824  ;;  %p4850_p12 = scmp.lt.s32.totalorder %s24_s12, %s24_s12 }
  0x1b   :  { %p4846_p11 = scmp.ne.s32.totalorder %s24_s12, %s4845_s20  ;;  %p4851_p13 = scmp.lt.s32.totalorder %s4845_s20, %s4845_s20 }
  0x1d   :  { %p4852_p0 = por %p4851_p13, %p4850_p12 }
  0x1f   :  { %p4853_p1 = pnand %p4852_p0, %p4846_p11 }
  0x21   :  { %4856 = shalt.err (!%p4853_p1)
}
  0x22   :  { %s4911_s3 = smov 576   ;;  %s4912_s21 = smov 36  }
  0x23   :  { %29 = dma.hbm_to_vmem [thread:$0]  %s5317_s2, 13824, %s24_s12, [#allocation5], %s4911_s3, %s4911_s3, %s4912_s21  }
  0x24   :  { %s4913_s24 = smov [#allocation9]   ;;  %s4857_s28 = scalar_lea.hbm %s5319_s4, 9216 }
  0x25   :  { %s47_s25 = sshll.u32 %s4913_s24, 4  ;;  %p4858_p2 = scmp.ne.s32.totalorder %s5319_s4, %s4857_s28  ;;  %s48_s25 = int_to_ptr.vmem [resolvable:$true] %s47_s25 }
  0x26   :  { %p4861_p3 = scmp.lt.u32.totalorder %s4857_s28, %s5319_s4 }
  0x28   :  { %p4863_p4 = pnand %p4861_p3, %p4858_p2 }
  0x2a   :  { %4866 = shalt.err (!%p4863_p4)
}
  0x2b   :  { %s4867_s11 = scalar_lea.vmem %s48_s25, 9216  ;;  %p4872_p6 = scmp.lt.s32.totalorder %s48_s25, %s48_s25 }
  0x2c   :  { %p4868_p5 = scmp.ne.s32.totalorder %s48_s25, %s4867_s11  ;;  %p4873_p7 = scmp.lt.s32.totalorder %s4867_s11, %s4867_s11 }
  0x2e   :  { %p4874_p8 = por %p4873_p7, %p4872_p6 }
  0x30   :  { %p4875_p9 = pnand %p4874_p8, %p4868_p5 }
  0x32   :  { %4878 = shalt.err (!%p4875_p9)
}
  0x33   :  { %s4914_s2 = smov 64   ;;  %s4915_s12 = smov 4  }
  0x34   :  { %53 = dma.hbm_to_vmem [thread:$0]  %s5319_s4, 9216, %s48_s25, [#allocation8], %s4914_s2, %s4914_s2, %s4915_s12  }
  0x35   :  { %4901 = dma.done.wait [#allocation5], 13824  }
  0x36   :  { %4902 = vsyncadd [#allocation5], 4294953472 }
  0x37   :  { %4903 = dma.done.wait [#allocation8], 27648  }
  0x38   :  { %4904 = vsyncadd [#allocation8], 4294939648  ;;  %v70_v0 = vld [vmem:[%s5316_s1 + $0x1] sm:$0xff]  ;;  %v71_v1 = vld [vmem:[%s5316_s1 + $0x9] sm:$0xff]  ;;  %vm94_vm0 = vcmask 523264  }
  0x39   :  { %v72_v2 = vld [vmem:[%s5316_s1 + $0x19] sm:$0xff]  ;;  %v4238_v3 = vpack.i.bf16 %v71_v1, %v70_v0  ;;  %v73_v4 = vld [vmem:[%s5316_s1 + $0x21] sm:$0xff]  ;;  %v4252_v8 = vld [vmem:[#allocation4] ss:$36 sps:$4 sm:$0xff]  }
  0x3a   :  { %v4248_v5 = vld [vmem:[#allocation4 + $0x4] ss:$36 sps:$4 sm:$0xff]   ;;  %v4243_v6 = vpack.i.bf16 %v73_v4, %v72_v2  ;;  %v4250_v7 = vld [vmem:[#allocation4 + $0xc] ss:$36 sps:$4 sm:$0xff]   ;;  %v4256_v11 = vld [vmem:[#allocation4 + $0x54] ss:$36 sps:$4 sm:$0xff]  }
  0x3b   :  { %4239 = vrot.lane.b32.xlu0 %v4238_v3, %s4914_s2  ;;  %v4253_v9 = vld [vmem:[#allocation4 + $0x8] ss:$36 sps:$4 sm:$0xff]   ;;  %830 = vmatprep.subr.bf16.mxu0 %v4248_v5  ;;  %v4259_v13 = vld [vmem:[#allocation4 + $0x50] ss:$36 sps:$4 sm:$0xff]   ;;  %v4262_v15 = vld [vmem:[#allocation4 + $0x9c] ss:$36 sps:$4 sm:$0xff]  }
  0x3c   :  { %v4254_v10 = vld [vmem:[#allocation4 + $0x4c] ss:$36 sps:$4 sm:$0xff]   ;;  %883 = vmatprep.subr.bf16.mxu1 %v4250_v7  ;;  %831 = vmatpush1.bf16.msra.mxu0 %v4252_v8  ;;  %v4260_v14 = vld [vmem:[#allocation4 + $0x94] ss:$36 sps:$4 sm:$0xff]   ;;  %v4266_v18 = vld [vmem:[#allocation4 + $0xdc] ss:$36 sps:$4 sm:$0xff]  }
  0x3d   :  { %884 = vmatpush1.bf16.msra.mxu1 %v4253_v9  ;;  %832 = vmatprep.subr.bf16.mxu0 %v4254_v10  ;;  %v4258_v12 = vld [vmem:[#allocation4 + $0x48] ss:$36 sps:$4 sm:$0xff]   ;;  %v4264_v16 = vld [vmem:[#allocation4 + $0x90] ss:$36 sps:$4 sm:$0xff]   ;;  %v4265_v17 = vld [vmem:[#allocation4 + $0x98] ss:$36 sps:$4 sm:$0xff]  }
  0x3e   :  { %885 = vmatprep.subr.bf16.mxu1 %v4256_v11  ;;  %v4268_v19 = vld [vmem:[#allocation4 + $0xe4] ss:$36 sps:$4 sm:$0xff]   ;;  %v4270_v20 = vld [vmem:[#allocation4 + $0xd8] ss:$36 sps:$4 sm:$0xff]   ;;  %v4274_v23 = vld [vmem:[#allocation4 + $0x12c] ss:$36 sps:$4 sm:$0xff]  }
  0x3f   :  { %4244 = vrot.lane.b32.xlu0 %v4243_v6, %s4914_s2  ;;  %v4271_v21 = vld [vmem:[#allocation4 + $0xe0] ss:$36 sps:$4 sm:$0xff]   ;;  %v4277_v25 = vld [vmem:[#allocation4 + $0x128] ss:$36 sps:$4 sm:$0xff]   ;;  %v4280_v27 = vld [vmem:[#allocation4 + $0x174] ss:$36 sps:$4 sm:$0xff]  }
  0x40   :  { %833 = vmatpush1.bf16.msra.mxu0 %v4258_v12  ;;  %v4272_v22 = vld [vmem:[#allocation4 + $0x124] ss:$36 sps:$4 sm:$0xff]   ;;  %v4278_v26 = vld [vmem:[#allocation4 + $0x16c] ss:$36 sps:$4 sm:$0xff]   ;;  %v4284_v30 = vld [vmem:[#allocation4 + $0x1b4] ss:$36 sps:$4 sm:$0xff]  }
  0x41   :  { %886 = vmatpush1.bf16.msra.mxu1 %v4259_v13  ;;  %834 = vmatprep.subr.bf16.mxu0 %v4260_v14  ;;  %v4276_v24 = vld [vmem:[#allocation4 + $0x120] ss:$36 sps:$4 sm:$0xff]   ;;  %v4282_v28 = vld [vmem:[#allocation4 + $0x168] ss:$36 sps:$4 sm:$0xff]   ;;  %v4283_v29 = vld [vmem:[#allocation4 + $0x170] ss:$36 sps:$4 sm:$0xff]  }
  0x42   :  { %887 = vmatprep.subr.bf16.mxu1 %v4262_v15  ;;  %v4286_v31 = vld [vmem:[#allocation4 + $0x1bc] ss:$36 sps:$4 sm:$0xff]   ;;  %v4288_v32 = vld [vmem:[#allocation4 + $0x1b0] ss:$36 sps:$4 sm:$0xff]   ;;  %v4292_v35 = vld [vmem:[#allocation4 + $0x204] ss:$36 sps:$4 sm:$0xff]  }
  0x43   :  { %v4289_v33 = vld [vmem:[#allocation4 + $0x1b8] ss:$36 sps:$4 sm:$0xff]   ;;  %v4295_v37 = vld [vmem:[#allocation4 + $0x200] ss:$36 sps:$4 sm:$0xff]   ;;  %v4298_v39 = vld [vmem:[#allocation4 + $0x24c] ss:$36 sps:$4 sm:$0xff]  }
  0x44   :  { %835 = vmatpush1.bf16.msra.mxu0 %v4264_v16  ;;  %v4290_v34 = vld [vmem:[#allocation4 + $0x1fc] ss:$36 sps:$4 sm:$0xff]   ;;  %v4296_v38 = vld [vmem:[#allocation4 + $0x244] ss:$36 sps:$4 sm:$0xff]   ;;  %v4302_v42 = vld [vmem:[#allocation4 + $0x28c] ss:$36 sps:$4 sm:$0xff]  }
  0x45   :  { %888 = vmatpush1.bf16.msra.mxu1 %v4265_v17  ;;  %836 = vmatprep.subr.bf16.mxu0 %v4266_v18  ;;  %v4294_v36 = vld [vmem:[#allocation4 + $0x1f8] ss:$36 sps:$4 sm:$0xff]   ;;  %v4300_v40 = vld [vmem:[#allocation4 + $0x240] ss:$36 sps:$4 sm:$0xff]   ;;  %v4301_v41 = vld [vmem:[#allocation4 + $0x248] ss:$36 sps:$4 sm:$0xff]  }
  0x46   :  { %889 = vmatprep.subr.bf16.mxu1 %v4268_v19  ;;  %v74_v43 = vld [vmem:[%s5316_s1 + $0x2] sm:$0xff]  ;;  %v75_v44 = vld [vmem:[%s5316_s1 + $0xa] sm:$0xff]  ;;  %v4306_v47 = vld [vmem:[#allocation4 + $0x288] ss:$36 sps:$4 sm:$0xff]  }
  0x47   :  { %v4304_v45 = vld [vmem:[#allocation4 + $0x294] ss:$36 sps:$4 sm:$0xff]   ;;  %v5011_v46 = vpack.c.bf16 %v75_v44, %v74_v43  ;;  %v4310_v50 = vld [vmem:[#allocation4 + $0x2dc] ss:$36 sps:$4 sm:$0xff]   ;;  %v4316_v54 = vld [vmem:[#allocation4 + $0x324] ss:$36 sps:$4 sm:$0xff]  }
  0x48   :  { %837 = vmatpush1.bf16.msra.mxu0 %v4270_v20  ;;  %v4307_v48 = vld [vmem:[#allocation4 + $0x290] ss:$36 sps:$4 sm:$0xff]   ;;  %v4313_v52 = vld [vmem:[#allocation4 + $0x2d8] ss:$36 sps:$4 sm:$0xff]   ;;  %v4319_v56 = vld [vmem:[#allocation4 + $0x320] ss:$36 sps:$4 sm:$0xff]  }
  0x49   :  { %890 = vmatpush1.bf16.msra.mxu1 %v4271_v21  ;;  %838 = vmatprep.subr.bf16.mxu0 %v4272_v22  ;;  %v4308_v49 = vld [vmem:[#allocation4 + $0x2d4] ss:$36 sps:$4 sm:$0xff]   ;;  %v4314_v53 = vld [vmem:[#allocation4 + $0x31c] ss:$36 sps:$4 sm:$0xff]   ;;  %v76_v62 = vld [vmem:[%s5316_s1 + $0x1a] sm:$0xff] }
  0x4a   :  { %891 = vmatprep.subr.bf16.mxu1 %v4274_v23  ;;  %3746 = vmatprep.mubr.msk.bf16.mxu0 %vm94_vm0, %v5011_v46  ;;  %v4312_v51 = vld [vmem:[#allocation4 + $0x2d0] ss:$36 sps:$4 sm:$0xff]   ;;  %v4318_v55 = vld [vmem:[#allocation4 + $0x318] ss:$36 sps:$4 sm:$0xff]   ;;  %v4331_v5 = vld [vmem:[#allocation4 + $0x64] ss:$36 sps:$4 sm:$0xff]  }
  0x4b   :  { %3748 = vmatprep.mubr.msk.bf16.mxu1 %vm94_vm0, %v5011_v46  ;;  %v4322_v57 = vld [vmem:[#allocation4 + $0x14] ss:$36 sps:$4 sm:$0xff]   ;;  %v4325_v58 = vld [vmem:[#allocation4 + $0x1c] ss:$36 sps:$4 sm:$0xff]   ;;  %v68_v8 = vld [vmem:[%s5316_s1 + $0x18] sm:$0xff] }
  0x4c   :  { %839 = vmatpush1.bf16.msra.mxu0 %v4276_v24  ;;  %v66_v59 = vld [vmem:[%s5316_s1] sm:$0xff]  ;;  %v67_v60 = vld [vmem:[%s5316_s1 + $0x8] sm:$0xff]  ;;  %v4329_v13 = vld [vmem:[#allocation4 + $0x60] ss:$36 sps:$4 sm:$0xff]  }
  0x4d   :  { %892 = vmatpush1.bf16.msra.mxu1 %v4277_v25  ;;  %840 = vmatprep.subr.bf16.mxu0 %v4278_v26  ;;  %v77_v63 = vld [vmem:[%s5316_s1 + $0x22] sm:$0xff]  ;;  %v4328_v4 = vld [vmem:[#allocation4 + $0x5c] ss:$36 sps:$4 sm:$0xff]   ;;  %v4334_v17 = vld [vmem:[#allocation4 + $0xa4] ss:$36 sps:$4 sm:$0xff]  }
  0x4e   :  { %893 = vmatprep.subr.bf16.mxu1 %v4280_v27  ;;  %v4320_v2 = vld [vmem:[#allocation4 + $0x10] ss:$36 sps:$4 sm:$0xff]   ;;  %v4323_v3 = vld [vmem:[#allocation4 + $0x18] ss:$36 sps:$4 sm:$0xff]   ;;  %v5039_v16 = vpack.c.bf16 %v77_v63, %v76_v62  ;;  %v4332_v21 = vld [vmem:[#allocation4 + $0xa0] ss:$36 sps:$4 sm:$0xff]  }
  0x4f   :  { %v69_v9 = vld [vmem:[%s5316_s1 + $0x20] sm:$0xff]  ;;  %v4326_v12 = vld [vmem:[#allocation4 + $0x58] ss:$36 sps:$4 sm:$0xff]   ;;  %v4335_v22 = vld [vmem:[#allocation4 + $0xa8] ss:$36 sps:$4 sm:$0xff]  }
  0x50   :  { %841 = vmatpush1.bf16.msra.mxu0 %v4282_v28  ;;  %v4337_v18 = vld [vmem:[#allocation4 + $0xac] ss:$36 sps:$4 sm:$0xff]   ;;  %v4343_v25 = vld [vmem:[#allocation4 + $0xf4] ss:$36 sps:$4 sm:$0xff]  }
  0x51   :  { %894 = vmatpush1.bf16.msra.mxu1 %v4283_v29  ;;  %842 = vmatprep.subr.bf16.mxu0 %v4284_v30  ;;  %v4340_v24 = vld [vmem:[#allocation4 + $0xec] ss:$36 sps:$4 sm:$0xff]   ;;  %v4346_v28 = vld [vmem:[#allocation4 + $0x134] ss:$36 sps:$4 sm:$0xff]   ;;  %v4349_v29 = vld [vmem:[#allocation4 + $0x13c] ss:$36 sps:$4 sm:$0xff]  }
  0x52   :  { %895 = vmatprep.subr.bf16.mxu1 %v4286_v31  ;;  %v4338_v26 = vld [vmem:[#allocation4 + $0xe8] ss:$36 sps:$4 sm:$0xff]   ;;  %v4341_v27 = vld [vmem:[#allocation4 + $0xf0] ss:$36 sps:$4 sm:$0xff]   ;;  %v4347_v31 = vld [vmem:[#allocation4 + $0x138] ss:$36 sps:$4 sm:$0xff]  }
  0x53   :  { %v4344_v30 = vld [vmem:[#allocation4 + $0x130] ss:$36 sps:$4 sm:$0xff]   ;;  %v5065_v43 = vld [vmem:[%s5315_s0 + $0x8] sm:$0xff]  ;;  %v4362_v44 = vld [vmem:[#allocation4 + $0x208] ss:$36 sps:$4 sm:$0xff]  }
  0x54   :  { %843 = vmatpush1.bf16.msra.mxu0 %v4288_v32  ;;  %v4352_v32 = vld [vmem:[#allocation4 + $0x17c] ss:$36 sps:$4 sm:$0xff]   ;;  %1136 = vst [vmem:[#allocation2 + $0x9] sm:$0xff] %v5065_v43  ;;  %v4386_v62 = vld [vmem:[#allocation4 + $0x328] ss:$36 sps:$4 sm:$0xff]  }
  0x55   :  { %896 = vmatpush1.bf16.msra.mxu1 %v4289_v33  ;;  %844 = vmatprep.subr.bf16.mxu0 %v4290_v34  ;;  %v4355_v33 = vld [vmem:[#allocation4 + $0x184] ss:$36 sps:$4 sm:$0xff]   ;;  %v4350_v34 = vld [vmem:[#allocation4 + $0x178] ss:$36 sps:$4 sm:$0xff]   ;;  %v4389_v63 = vld [vmem:[#allocation4 + $0x330] ss:$36 sps:$4 sm:$0xff]  }
  0x56   :  { %897 = vmatprep.subr.bf16.mxu1 %v4292_v35  ;;  %v4353_v35 = vld [vmem:[#allocation4 + $0x180] ss:$36 sps:$4 sm:$0xff]  }
  0x58   :  { %845 = vmatpush1.bf16.msra.mxu0 %v4294_v36  ;;  %v4358_v36 = vld [vmem:[#allocation4 + $0x1c4] ss:$36 sps:$4 sm:$0xff]  }
  0x59   :  { %898 = vmatpush1.bf16.msra.mxu1 %v4295_v37  ;;  %846 = vmatprep.subr.bf16.mxu0 %v4296_v38  ;;  %v4361_v37 = vld [vmem:[#allocation4 + $0x1cc] ss:$36 sps:$4 sm:$0xff]   ;;  %v4356_v38 = vld [vmem:[#allocation4 + $0x1c0] ss:$36 sps:$4 sm:$0xff]  }
  0x5a   :  { %899 = vmatprep.subr.bf16.mxu1 %v4298_v39  ;;  %v4359_v39 = vld [vmem:[#allocation4 + $0x1c8] ss:$36 sps:$4 sm:$0xff]  }
  0x5c   :  { %847 = vmatpush1.bf16.msra.mxu0 %v4300_v40  ;;  %v4364_v40 = vld [vmem:[#allocation4 + $0x20c] ss:$36 sps:$4 sm:$0xff]  }
  0x5d   :  { %900 = vmatpush1.bf16.msra.mxu1 %v4301_v41  ;;  %848 = vmatprep.subr.bf16.mxu0 %v4302_v42  ;;  %v4367_v41 = vld [vmem:[#allocation4 + $0x214] ss:$36 sps:$4 sm:$0xff]  }
  0x5e   :  { %901 = vmatprep.subr.bf16.mxu1 %v4304_v45  ;;  %v5060_v42 = vld [vmem:[%s5315_s0] sm:$0xff] }
  0x5f   :  { %v4365_v45 = vld [vmem:[#allocation4 + $0x210] ss:$36 sps:$4 sm:$0xff]   ;;  %1135 = vst [vmem:[#allocation2 + $0x1] sm:$0xff] %v5060_v42 }
  0x60   :  { %849 = vmatpush1.bf16.msra.mxu0 %v4306_v47  ;;  %v4916_v47 = vmov 0.0  }
  0x61   :  { %902 = vmatpush1.bf16.msra.mxu1 %v4307_v48  ;;  %850 = vmatprep.subr.bf16.mxu0 %v4308_v49  ;;  %1127 = vst [vmem:[#allocation2] sm:$0x1] %v4916_v47  ;;  %1128 = vst [vmem:[#allocation2 + $0x18] sm:$0x1] %v4916_v47  ;;  %v4370_v48 = vld [vmem:[#allocation4 + $0x254] ss:$36 sps:$4 sm:$0xff]  }
  0x62   :  { %903 = vmatprep.subr.bf16.mxu1 %v4310_v50  ;;  %1129 = vst [vmem:[#allocation2 + $0x11] sm:$0x1] %v4916_v47  ;;  %1130 = vst [vmem:[#allocation2 + $0x29] sm:$0x1] %v4916_v47  ;;  %v4373_v49 = vld [vmem:[#allocation4 + $0x25c] ss:$36 sps:$4 sm:$0xff]  }
  0x63   :  { %v4368_v50 = vld [vmem:[#allocation4 + $0x250] ss:$36 sps:$4 sm:$0xff]   ;;  %v4446_v47 = vld [vmem:[#allocation7 + $0xe0] ss:$8 sps:$4 sm:$0xff]  }
  0x64   :  { %851 = vmatpush1.bf16.msra.mxu0 %v4312_v51  ;;  %v4371_v51 = vld [vmem:[#allocation4 + $0x258] ss:$36 sps:$4 sm:$0xff]  }
  0x65   :  { %904 = vmatpush1.bf16.msra.mxu1 %v4313_v52  ;;  %852 = vmatprep.subr.bf16.mxu0 %v4314_v53  ;;  %v4376_v52 = vld [vmem:[#allocation4 + $0x29c] ss:$36 sps:$4 sm:$0xff]   ;;  %v4379_v53 = vld [vmem:[#allocation4 + $0x2a4] ss:$36 sps:$4 sm:$0xff]  }
  0x66   :  { %905 = vmatprep.subr.bf16.mxu1 %v4316_v54  ;;  %v4374_v54 = vld [vmem:[#allocation4 + $0x298] ss:$36 sps:$4 sm:$0xff]  }
  0x68   :  { %853 = vmatpush1.bf16.msra.mxu0 %v4318_v55  ;;  %v4377_v55 = vld [vmem:[#allocation4 + $0x2a0] ss:$36 sps:$4 sm:$0xff]  }
  0x69   :  { %906 = vmatpush1.bf16.msra.mxu1 %v4319_v56  ;;  %936 = vmatprep.subr.bf16.mxu0 %v4322_v57  ;;  %v4382_v56 = vld [vmem:[#allocation4 + $0x2e4] ss:$36 sps:$4 sm:$0xff]   ;;  %v4385_v57 = vld [vmem:[#allocation4 + $0x2ec] ss:$36 sps:$4 sm:$0xff]  }
  0x6a   :  { %989 = vmatprep.subr.bf16.mxu1 %v4325_v58  ;;  %v4380_v58 = vld [vmem:[#allocation4 + $0x2e0] ss:$36 sps:$4 sm:$0xff]  }
  0xad   :  { %v4240_v61 = vpop.permute.xlu0 %4239 }
  0xae   :  { %v4242_v0 = vunpack.i.h.bf16 %v4240_v61  ;;  %v4241_v1 = vunpack.i.l.bf16 %v4240_v61  ;;  %v4391_v61 = vld [vmem:[#allocation4 + $0x334] ss:$36 sps:$4 sm:$0xff]  }
  0xb0   :  { %v95_v6 = vsel %vm94_vm0, %v66_v59, %v4241_v1  ;;  %v96_v7 = vsel %vm94_vm0, %v67_v60, %v4242_v0  ;;  %v4383_v59 = vld [vmem:[#allocation4 + $0x2e8] ss:$36 sps:$4 sm:$0xff]   ;;  %v4392_v0 = vld [vmem:[#allocation4 + $0x20] ss:$36 sps:$4 sm:$0xff]  }
  0xb1   :  { %v5037_v10 = vpack.c.bf16 %v96_v7, %v95_v6  ;;  %v4245_v11 = vpop.permute.xlu0 %4244  ;;  %v4388_v60 = vld [vmem:[#allocation4 + $0x32c] ss:$36 sps:$4 sm:$0xff]   ;;  %v5072_v1 = vld [vmem:[%s5315_s0 + $0x10] sm:$0xff]  ;;  %v4395_v6 = vld [vmem:[#allocation4 + $0xf8] ss:$36 sps:$4 sm:$0xff]  }
  0xb2   :  { %v4247_v14 = vunpack.i.h.bf16 %v4245_v11  ;;  %v4246_v15 = vunpack.i.l.bf16 %v4245_v11  ;;  %1137 = vst [vmem:[#allocation2 + $0x19] sm:$0xff] %v5072_v1  ;;  %v4396_v7 = vld [vmem:[#allocation4 + $0x140] ss:$36 sps:$4 sm:$0xff]   ;;  %v4399_v11 = vld [vmem:[#allocation4 + $0x218] ss:$36 sps:$4 sm:$0xff]  }
  0xb3   :  { %863 = vmatmul.mubr.bf16.vlgmr.msra.gmra.mrb[0].mxu0 %v5037_v10  ;;  %916 = vmatmul.mubr.bf16.vlgmr.msra.gmra.mrb[0].mxu1 %v5037_v10 }
  0xb4   :  { %937 = vmatpush1.bf16.msra.mxu0 %v4320_v2  ;;  %990 = vmatpush1.bf16.msra.mxu1 %v4323_v3  ;;  %v97_v19 = vsel %vm94_vm0, %v68_v8, %v4246_v15  ;;  %v98_v20 = vsel %vm94_vm0, %v69_v9, %v4247_v14  ;;  %v4917_v2 = vmov 0   ;;  %v5078_v3 = vld [vmem:[%s5315_s0 + $0x18] sm:$0xff]  ;;  %v4398_v9 = vld [vmem:[#allocation4 + $0x1d0] ss:$36 sps:$4 sm:$0xff]   ;;  %v4403_v14 = vld [vmem:[#allocation4 + $0x338] ss:$36 sps:$4 sm:$0xff]  }
  0xb5   :  { %938 = vmatprep.subr.bf16.mxu0 %v4328_v4  ;;  %991 = vmatprep.subr.bf16.mxu1 %v4331_v5  ;;  %v5049_v23 = vpack.c.bf16 %v98_v20, %v97_v19  ;;  %1138 = vst [vmem:[#allocation2 + $0x21] sm:$0xff] %v5078_v3  ;;  %v4393_v4 = vld [vmem:[#allocation4 + $0x68] ss:$36 sps:$4 sm:$0xff]   ;;  %v4394_v5 = vld [vmem:[#allocation4 + $0xb0] ss:$36 sps:$4 sm:$0xff]  }
  0xb6   :  { %3749 = vmatprep.mubr.msk.bf16.mxu1 %vm94_vm0, %v5039_v16  ;;  %3747 = vmatprep.mubr.msk.bf16.mxu0 %vm94_vm0, %v5039_v16  ;;  %v4397_v8 = vld [vmem:[#allocation4 + $0x188] ss:$36 sps:$4 sm:$0xff]   ;;  %v4407_v19 = vld [vmem:[#allocation7 + $0x10] ss:$8 sps:$4 sm:$0xff]  }
  0xb7   :  { %v4406_v15 = vld [vmem:[#allocation7 + $0x4] ss:$8 sps:$4 sm:$0xff]  }
  0xb8   :  { %939 = vmatpush1.bf16.msra.mxu0 %v4326_v12  ;;  %992 = vmatpush1.bf16.msra.mxu1 %v4329_v13  ;;  %v4401_v12 = vld [vmem:[#allocation4 + $0x2a8] ss:$36 sps:$4 sm:$0xff]   ;;  %v4402_v13 = vld [vmem:[#allocation4 + $0x2f0] ss:$36 sps:$4 sm:$0xff]  }
  0xb9   :  { %940 = vmatprep.subr.bf16.mxu0 %v4334_v17  ;;  %993 = vmatprep.subr.bf16.mxu1 %v4337_v18  ;;  %v4404_v17 = vld [vmem:[#allocation7] ss:$8 sps:$4 sm:$0xff]   ;;  %v4409_v18 = vld [vmem:[#allocation7 + $0x14] ss:$8 sps:$4 sm:$0xff]   ;;  %v4412_v20 = vld [vmem:[#allocation7 + $0x24] ss:$8 sps:$4 sm:$0xff]  }
  0xbb   :  { %926 = vmatmul.mubr.bf16.gmra.mrb[4].mxu1 %v5049_v23  ;;  %873 = vmatmul.mubr.bf16.gmra.mrb[4].mxu0 %v5049_v23 }
  0xbc   :  { %941 = vmatpush1.bf16.msra.mxu0 %v4332_v21  ;;  %994 = vmatpush1.bf16.msra.mxu1 %v4335_v22  ;;  %v4410_v21 = vld [vmem:[#allocation7 + $0x20] ss:$8 sps:$4 sm:$0xff]   ;;  %v1168_v22 = vpack.c.bf16 %v5065_v43, %v5060_v42 }
  0xbd   :  { %942 = vmatprep.subr.bf16.mxu0 %v4340_v24  ;;  %995 = vmatprep.subr.bf16.mxu1 %v4343_v25  ;;  %v4415_v24 = vld [vmem:[#allocation7 + $0x34] ss:$8 sps:$4 sm:$0xff]   ;;  %v4413_v25 = vld [vmem:[#allocation7 + $0x30] ss:$8 sps:$4 sm:$0xff]  }
  0xbe   :  { %3750 = vmatprep.mubr.msk.bf16.mxu0 %vm94_vm0, %v5011_v46  ;;  %3752 = vmatprep.mubr.msk.bf16.mxu1 %vm94_vm0, %v5011_v46 }
  0xc0   :  { %943 = vmatpush1.bf16.msra.mxu0 %v4338_v26  ;;  %996 = vmatpush1.bf16.msra.mxu1 %v4341_v27  ;;  %v4416_v26 = vld [vmem:[#allocation7 + $0x40] ss:$8 sps:$4 sm:$0xff]   ;;  %v4419_v27 = vld [vmem:[#allocation7 + $0x50] ss:$8 sps:$4 sm:$0xff]  }
  0xc1   :  { %944 = vmatprep.subr.bf16.mxu0 %v4346_v28  ;;  %997 = vmatprep.subr.bf16.mxu1 %v4349_v29  ;;  %v4424_v28 = vld [vmem:[#allocation7 + $0x64] ss:$8 sps:$4 sm:$0xff]   ;;  %v4422_v29 = vld [vmem:[#allocation7 + $0x60] ss:$8 sps:$4 sm:$0xff]  }
  0xc4   :  { %945 = vmatpush1.bf16.msra.mxu0 %v4344_v30  ;;  %998 = vmatpush1.bf16.msra.mxu1 %v4347_v31  ;;  %v4427_v30 = vld [vmem:[#allocation7 + $0x74] ss:$8 sps:$4 sm:$0xff]   ;;  %v4425_v31 = vld [vmem:[#allocation7 + $0x70] ss:$8 sps:$4 sm:$0xff]  }
  0xc5   :  { %946 = vmatprep.subr.bf16.mxu0 %v4352_v32  ;;  %999 = vmatprep.subr.bf16.mxu1 %v4355_v33  ;;  %v4428_v32 = vld [vmem:[#allocation7 + $0x80] ss:$8 sps:$4 sm:$0xff]   ;;  %v4433_v33 = vld [vmem:[#allocation7 + $0x94] ss:$8 sps:$4 sm:$0xff]  }
  0xc8   :  { %947 = vmatpush1.bf16.msra.mxu0 %v4350_v34  ;;  %1000 = vmatpush1.bf16.msra.mxu1 %v4353_v35  ;;  %v4431_v34 = vld [vmem:[#allocation7 + $0x90] ss:$8 sps:$4 sm:$0xff]   ;;  %v4436_v35 = vld [vmem:[#allocation7 + $0xa4] ss:$8 sps:$4 sm:$0xff]  }
  0xc9   :  { %948 = vmatprep.subr.bf16.mxu0 %v4358_v36  ;;  %1001 = vmatprep.subr.bf16.mxu1 %v4361_v37  ;;  %v4434_v36 = vld [vmem:[#allocation7 + $0xa0] ss:$8 sps:$4 sm:$0xff]   ;;  %v4439_v37 = vld [vmem:[#allocation7 + $0xb4] ss:$8 sps:$4 sm:$0xff]  }
  0xcc   :  { %949 = vmatpush1.bf16.msra.mxu0 %v4356_v38  ;;  %1002 = vmatpush1.bf16.msra.mxu1 %v4359_v39  ;;  %v4437_v38 = vld [vmem:[#allocation7 + $0xb0] ss:$8 sps:$4 sm:$0xff]   ;;  %v4442_v39 = vld [vmem:[#allocation7 + $0xc4] ss:$8 sps:$4 sm:$0xff]  }
  0xcd   :  { %950 = vmatprep.subr.bf16.mxu0 %v4364_v40  ;;  %1003 = vmatprep.subr.bf16.mxu1 %v4367_v41  ;;  %v4440_v40 = vld [vmem:[#allocation7 + $0xc0] ss:$8 sps:$4 sm:$0xff]   ;;  %v4445_v41 = vld [vmem:[#allocation7 + $0xd4] ss:$8 sps:$4 sm:$0xff]  }
  0xd0   :  { %951 = vmatpush1.bf16.msra.mxu0 %v4362_v44  ;;  %1004 = vmatpush1.bf16.msra.mxu1 %v4365_v45  ;;  %v4443_v44 = vld [vmem:[#allocation7 + $0xd0] ss:$8 sps:$4 sm:$0xff]   ;;  %v4448_v45 = vld [vmem:[#allocation7 + $0xe4] ss:$8 sps:$4 sm:$0xff]  }
  0xd1   :  { %952 = vmatprep.subr.bf16.mxu0 %v4370_v48  ;;  %1005 = vmatprep.subr.bf16.mxu1 %v4373_v49  ;;  %v4451_v48 = vld [vmem:[#allocation7 + $0xf4] ss:$8 sps:$4 sm:$0xff]   ;;  %v4449_v49 = vld [vmem:[#allocation7 + $0xf0] ss:$8 sps:$4 sm:$0xff]  }
  0xd4   :  { %953 = vmatpush1.bf16.msra.mxu0 %v4368_v50  ;;  %1006 = vmatpush1.bf16.msra.mxu1 %v4371_v51  ;;  %v1155_v50 = vld [vmem:[#allocation2] sm:$0xff]  ;;  %v1156_v51 = vld [vmem:[#allocation2 + $0x8] sm:$0xff] }
  0xd5   :  { %954 = vmatprep.subr.bf16.mxu0 %v4376_v52  ;;  %1007 = vmatprep.subr.bf16.mxu1 %v4379_v53  ;;  %v4454_v52 = vld [vmem:[#allocation7 + $0x104] ss:$8 sps:$4 sm:$0xff]   ;;  %v1167_v53 = vpack.c.bf16 %v1156_v51, %v1155_v50 }
  0xd6   :  { %v4490_v50 = vld [vmem:[#allocation9 + $0x68] sm:$0xff]  }
  0xd7   :  { %v4491_v51 = vld [vmem:[#allocation9 + $0x28] sm:$0xff]  }
  0xd8   :  { %955 = vmatpush1.bf16.msra.mxu0 %v4374_v54  ;;  %1008 = vmatpush1.bf16.msra.mxu1 %v4377_v55  ;;  %v4452_v54 = vld [vmem:[#allocation7 + $0x100] ss:$8 sps:$4 sm:$0xff]   ;;  %v1171_v55 = vpack.c.bf16 %v5078_v3, %v5072_v1 }
  0xd9   :  { %956 = vmatprep.subr.bf16.mxu0 %v4382_v56  ;;  %1009 = vmatprep.subr.bf16.mxu1 %v4385_v57  ;;  %v4457_v56 = vld [vmem:[#allocation7 + $0x114] ss:$8 sps:$4 sm:$0xff]   ;;  %v4455_v57 = vld [vmem:[#allocation7 + $0x110] ss:$8 sps:$4 sm:$0xff]  }
  0xdc   :  { %957 = vmatpush1.bf16.msra.mxu0 %v4380_v58  ;;  %1010 = vmatpush1.bf16.msra.mxu1 %v4383_v59  ;;  %v1157_v58 = vld [vmem:[#allocation2 + $0x18] sm:$0xff]  ;;  %v1158_v59 = vld [vmem:[#allocation2 + $0x20] sm:$0xff] }
  0xdd   :  { %958 = vmatprep.subr.bf16.mxu0 %v4388_v60  ;;  %1011 = vmatprep.subr.bf16.mxu1 %v4391_v61  ;;  %v4460_v60 = vld [vmem:[#allocation7 + $0x124] ss:$8 sps:$4 sm:$0xff]   ;;  %v1170_v61 = vpack.c.bf16 %v1158_v59, %v1157_v58 }
  0xde   :  { %v4495_v59 = vld [vmem:[#allocation9 + $0xa8] sm:$0xff]  }
  0xe0   :  { %959 = vmatpush1.bf16.msra.mxu0 %v4386_v62  ;;  %1012 = vmatpush1.bf16.msra.mxu1 %v4389_v63  ;;  %v4458_v62 = vld [vmem:[#allocation7 + $0x120] ss:$8 sps:$4 sm:$0xff]   ;;  %v4463_v63 = vld [vmem:[#allocation7 + $0x134] ss:$8 sps:$4 sm:$0xff]  }
  0xe1   :  { %1042 = vmatprep.subr.bf16.mxu0 %v4917_v2 }
  0xe3   :  { %969 = vmatmul.mubr.bf16.vlgmr.msra.gmra.mrb[8].mxu0 %v5037_v10  ;;  %1022 = vmatmul.mubr.bf16.vlgmr.msra.gmra.mrb[8].mxu1 %v5037_v10 }
  0xe4   :  { %1043 = vmatpush1.bf16.msra.mxu0 %v4392_v0  ;;  %3751 = vmatprep.mubr.msk.bf16.mxu0 %vm94_vm0, %v5039_v16  ;;  %v4461_v0 = vld [vmem:[#allocation7 + $0x130] ss:$8 sps:$4 sm:$0xff]  }
  0xe5   :  { %1044 = vmatprep.subr.bf16.mxu0 %v4917_v2  ;;  %3753 = vmatprep.mubr.msk.bf16.mxu1 %vm94_vm0, %v5039_v16 }
  0xe8   :  { %1045 = vmatpush1.bf16.msra.mxu0 %v4393_v4  ;;  %v4466_v4 = vld [vmem:[#allocation7 + $0x144] ss:$8 sps:$4 sm:$0xff]  }
  0xe9   :  { %1046 = vmatprep.subr.bf16.mxu0 %v4917_v2 }
  0xeb   :  { %979 = vmatmul.mubr.bf16.gmra.mrb[12].mxu0 %v5049_v23  ;;  %1032 = vmatmul.mubr.bf16.gmra.mrb[12].mxu1 %v5049_v23 }
  0xec   :  { %1047 = vmatpush1.bf16.msra.mxu0 %v4394_v5  ;;  %3754 = vmatprep.mubr.msk.bf16.mxu0 %vm94_vm0, %v5011_v46  ;;  %v4400_v46 = vld [vmem:[#allocation4 + $0x260] ss:$36 sps:$4 sm:$0xff]  }
  0xed   :  { %1048 = vmatprep.subr.bf16.mxu0 %v4917_v2  ;;  %v4464_v5 = vld [vmem:[#allocation7 + $0x140] ss:$8 sps:$4 sm:$0xff]  }
  0xf0   :  { %1049 = vmatpush1.bf16.msra.mxu0 %v4395_v6  ;;  %v4469_v6 = vld [vmem:[#allocation7 + $0x154] ss:$8 sps:$4 sm:$0xff]  }
  0xf1   :  { %1050 = vmatprep.subr.bf16.mxu0 %v4917_v2 }
  0xf4   :  { %1051 = vmatpush1.bf16.msra.mxu0 %v4396_v7  ;;  %v4467_v7 = vld [vmem:[#allocation7 + $0x150] ss:$8 sps:$4 sm:$0xff]  }
  0xf5   :  { %1052 = vmatprep.subr.bf16.mxu0 %v4917_v2 }
  0xf8   :  { %1053 = vmatpush1.bf16.msra.mxu0 %v4397_v8  ;;  %v4472_v8 = vld [vmem:[#allocation7 + $0x164] ss:$8 sps:$4 sm:$0xff]  }
  0xf9   :  { %1054 = vmatprep.subr.bf16.mxu0 %v4917_v2 }
  0xfc   :  { %1055 = vmatpush1.bf16.msra.mxu0 %v4398_v9  ;;  %v4470_v9 = vld [vmem:[#allocation7 + $0x160] ss:$8 sps:$4 sm:$0xff]  }
  0xfd   :  { %1056 = vmatprep.subr.bf16.mxu0 %v4917_v2 }
 0x100   :  { %1057 = vmatpush1.bf16.msra.mxu0 %v4399_v11  ;;  %v4475_v11 = vld [vmem:[#allocation7 + $0x174] ss:$8 sps:$4 sm:$0xff]  }
 0x101   :  { %1058 = vmatprep.subr.bf16.mxu0 %v4917_v2 }
 0x104   :  { %1059 = vmatpush1.bf16.msra.mxu0 %v4400_v46  ;;  %v4473_v46 = vld [vmem:[#allocation7 + $0x170] ss:$8 sps:$4 sm:$0xff]  }
 0x105   :  { %1060 = vmatprep.subr.bf16.mxu0 %v4917_v2 }
 0x108   :  { %1061 = vmatpush1.bf16.msra.mxu0 %v4401_v12  ;;  %v1163_v12 = vld [vmem:[#allocation2 + $0x2] sm:$0xff] }
 0x109   :  { %1062 = vmatprep.subr.bf16.mxu0 %v4917_v2 }
 0x10c   :  { %1063 = vmatpush1.bf16.msra.mxu0 %v4402_v13  ;;  %v1164_v13 = vld [vmem:[#allocation2 + $0xa] sm:$0xff] }
 0x10d   :  { %1064 = vmatprep.subr.bf16.mxu0 %v4917_v2 }
 0x110   :  { %1065 = vmatpush1.bf16.msra.mxu0 %v4403_v14  ;;  %v1169_v14 = vpack.c.bf16 %v1164_v13, %v1163_v12 }
 0x111   :  { %1461 = vmatprep.subr.bf16.mxu0 %v4406_v15  ;;  %v1165_v15 = vld [vmem:[#allocation2 + $0x1a] sm:$0xff] }
 0x113   :  { %1075 = vmatmul.mubr.bf16.vlgmr.msra.gmra.mrb[16].mxu0 %v5037_v10  ;;  %v4418_v10 = vld [vmem:[#allocation7 + $0x44] ss:$8 sps:$4 sm:$0xff]  }
 0x114   :  { %1462 = vmatpush1.bf16.msra.mxu0 %v4404_v17  ;;  %3755 = vmatprep.mubr.msk.bf16.mxu0 %vm94_vm0, %v5039_v16  ;;  %v4421_v16 = vld [vmem:[#allocation7 + $0x54] ss:$8 sps:$4 sm:$0xff]  }
 0x115   :  { %1463 = vmatprep.subr.bf16.mxu0 %v4409_v18  ;;  %v1166_v17 = vld [vmem:[#allocation2 + $0x22] sm:$0xff] }
 0x116   :  { %v1172_v18 = vpack.c.bf16 %v1166_v17, %v1165_v15 }
 0x118   :  { %1464 = vmatpush1.bf16.msra.mxu0 %v4407_v19 }
 0x119   :  { %1465 = vmatprep.subr.bf16.mxu0 %v4412_v20 }
 0x11b   :  { %1083 = vmatmul.mubr.bf16.gmra.mrb[20].mxu0 %v5049_v23  ;;  %v4430_v23 = vld [vmem:[#allocation7 + $0x84] ss:$8 sps:$4 sm:$0xff]  }
 0x11c   :  { %1466 = vmatpush1.bf16.msra.mxu0 %v4410_v21  ;;  %1493 = vmatprep.mubr.bf16.mxu0 %v1168_v22 }
 0x11d   :  { %1467 = vmatprep.subr.bf16.mxu0 %v4415_v24 }
 0x120   :  { %1468 = vmatpush1.bf16.msra.mxu0 %v4413_v25 }
 0x121   :  { %1469 = vmatprep.subr.bf16.mxu0 %v4418_v10 }
 0x124   :  { %1470 = vmatpush1.bf16.msra.mxu0 %v4416_v26 }
 0x125   :  { %1471 = vmatprep.subr.bf16.mxu0 %v4421_v16 }
 0x128   :  { %1472 = vmatpush1.bf16.msra.mxu0 %v4419_v27 }
 0x129   :  { %1473 = vmatprep.subr.bf16.mxu0 %v4424_v28 }
 0x12c   :  { %1474 = vmatpush1.bf16.msra.mxu0 %v4422_v29 }
 0x12d   :  { %1475 = vmatprep.subr.bf16.mxu0 %v4427_v30 }
 0x130   :  { %1476 = vmatpush1.bf16.msra.mxu0 %v4425_v31 }
 0x131   :  { %1477 = vmatprep.subr.bf16.mxu0 %v4430_v23 }
 0x134   :  { %1478 = vmatpush1.bf16.msra.mxu0 %v4428_v32 }
 0x135   :  { %1479 = vmatprep.subr.bf16.mxu0 %v4433_v33  ;;  %v4476_v33 = vld [vmem:[#allocation9 + $0x40] sm:$0xff]  }
 0x138   :  { %1480 = vmatpush1.bf16.msra.mxu0 %v4431_v34  ;;  %v4477_v34 = vld [vmem:[#allocation9] sm:$0xff]  }
 0x139   :  { %1481 = vmatprep.subr.bf16.mxu0 %v4436_v35  ;;  %v4478_v35 = vld [vmem:[#allocation9 + $0x48] sm:$0xff]  }
 0x13c   :  { %1482 = vmatpush1.bf16.msra.mxu0 %v4434_v36  ;;  %v4479_v36 = vld [vmem:[#allocation9 + $0x8] sm:$0xff]  }
 0x13d   :  { %1483 = vmatprep.subr.bf16.mxu0 %v4439_v37  ;;  %v4480_v37 = vld [vmem:[#allocation9 + $0x80] sm:$0xff]  }
 0x13e   :  { %4110 = vmatprep.subr.bf16.mxu1 %v4480_v37 }
 0x13f   :  { %4111 = vmatpush3.bf16.msra.mxu1 %v4480_v37 }
 0x140   :  { %1484 = vmatpush1.bf16.msra.mxu0 %v4437_v38  ;;  %v4481_v38 = vld [vmem:[#allocation9 + $0x50] sm:$0xff]  }
 0x141   :  { %1485 = vmatprep.subr.bf16.mxu0 %v4442_v39  ;;  %v4482_v39 = vld [vmem:[#allocation9 + $0x10] sm:$0xff]  }
 0x144   :  { %1486 = vmatpush1.bf16.msra.mxu0 %v4440_v40  ;;  %v4483_v40 = vld [vmem:[#allocation9 + $0x88] sm:$0xff]  }
 0x145   :  { %1487 = vmatprep.subr.bf16.mxu0 %v4445_v41  ;;  %v4484_v41 = vld [vmem:[#allocation9 + $0x58] sm:$0xff]   ;;  %4112 = vmatprep.subr.bf16.mxu1 %v4483_v40 }
 0x146   :  { %4113 = vmatpush3.bf16.msra.mxu1 %v4483_v40 }
 0x148   :  { %1488 = vmatpush1.bf16.msra.mxu0 %v4443_v44  ;;  %v4485_v44 = vld [vmem:[#allocation9 + $0x18] sm:$0xff]  }
 0x149   :  { %1489 = vmatprep.subr.bf16.mxu0 %v4448_v45  ;;  %v4486_v45 = vld [vmem:[#allocation9 + $0x90] sm:$0xff]  }
 0x14a   :  { %4114 = vmatprep.subr.bf16.mxu1 %v4486_v45 }
 0x14b   :  { %4115 = vmatpush3.bf16.msra.mxu1 %v4486_v45 }
 0x14c   :  { %1490 = vmatpush1.bf16.msra.mxu0 %v4446_v47  ;;  %v4487_v47 = vld [vmem:[#allocation9 + $0x60] sm:$0xff]  }
 0x14d   :  { %1491 = vmatprep.subr.bf16.mxu0 %v4451_v48  ;;  %v4488_v48 = vld [vmem:[#allocation9 + $0x20] sm:$0xff]  }
 0x150   :  { %1492 = vmatpush1.bf16.msra.mxu0 %v4449_v49  ;;  %v4489_v49 = vld [vmem:[#allocation9 + $0x98] sm:$0xff]  }
 0x151   :  { %1514 = vmatprep.subr.bf16.mxu0 %v4454_v52  ;;  %4116 = vmatprep.subr.bf16.mxu1 %v4489_v49 }
 0x152   :  { %4117 = vmatpush3.bf16.msra.mxu1 %v4489_v49 }
 0x153   :  { %1494 = vmatmul.mubr.bf16.vlgmr.msra.gmra.mrb[0].mxu0 %v1167_v53 }
 0x154   :  { %1515 = vmatpush1.bf16.msra.mxu0 %v4452_v54  ;;  %1503 = vmatprep.mubr.bf16.mxu0 %v1171_v55  ;;  %v4492_v54 = vld [vmem:[#allocation9 + $0xa0] sm:$0xff]   ;;  %v4493_v55 = vld [vmem:[#allocation9 + $0x70] sm:$0xff]  }
 0x155   :  { %1516 = vmatprep.subr.bf16.mxu0 %v4457_v56  ;;  %4118 = vmatprep.subr.bf16.mxu1 %v4492_v54 }
 0x156   :  { %4119 = vmatpush3.bf16.msra.mxu1 %v4492_v54 }
 0x157   :  { %4120 = vmatprep.subr.bf16.mxu1 %v4495_v59 }
 0x158   :  { %1517 = vmatpush1.bf16.msra.mxu0 %v4455_v57  ;;  %v4494_v57 = vld [vmem:[#allocation9 + $0x30] sm:$0xff]  }
 0x159   :  { %1518 = vmatprep.subr.bf16.mxu0 %v4460_v60  ;;  %v4496_v60 = vld [vmem:[#allocation9 + $0x78] sm:$0xff]  }
 0x15a   :  { %4121 = vmatpush3.bf16.msra.mxu1 %v4495_v59 }
 0x15b   :  { %1504 = vmatmul.mubr.bf16.gmra.mrb[4].mxu0 %v1170_v61  ;;  %v4497_v61 = vld [vmem:[#allocation9 + $0x38] sm:$0xff]  }
 0x15c   :  { %1519 = vmatpush1.bf16.msra.mxu0 %v4458_v62  ;;  %1546 = vmatprep.mubr.bf16.mxu0 %v4917_v2 }
 0x15d   :  { %1520 = vmatprep.subr.bf16.mxu0 %v4463_v63 }
 0x160   :  { %1521 = vmatpush1.bf16.msra.mxu0 %v4461_v0  ;;  %v4498_v0 = vld [vmem:[#allocation9 + $0xb0] sm:$0xff]  }
 0x161   :  { %1522 = vmatprep.subr.bf16.mxu0 %v4466_v4  ;;  %4122 = vmatprep.subr.bf16.mxu1 %v4498_v0 }
 0x162   :  { %4123 = vmatpush3.bf16.msra.mxu1 %v4498_v0 }
 0x164   :  { %1523 = vmatpush1.bf16.msra.mxu0 %v4464_v5 }
 0x165   :  { %1524 = vmatprep.subr.bf16.mxu0 %v4469_v6  ;;  %v4499_v6 = vld [vmem:[#allocation9 + $0xb8] sm:$0xff]  }
 0x166   :  { %4124 = vmatprep.subr.bf16.mxu1 %v4499_v6 }
 0x167   :  { %4125 = vmatpush3.bf16.msra.mxu1 %v4499_v6 }
 0x168   :  { %1525 = vmatpush1.bf16.msra.mxu0 %v4467_v7  ;;  %v4502_v7 = vld [vmem:[#allocation7 + $0x184] ss:$8 sps:$4 sm:$0xff]  }
 0x169   :  { %1526 = vmatprep.subr.bf16.mxu0 %v4472_v8  ;;  %2286 = vmatprep.subr.bf16.mxu1 %v4502_v7  ;;  %v227_v8 = vlaneseq }
 0x16c   :  { %1527 = vmatpush1.bf16.msra.mxu0 %v4470_v9  ;;  %v5153_v9 = vshrl.u32 %v227_v8, 7 }
 0x16d   :  { %1528 = vmatprep.subr.bf16.mxu0 %v4475_v11 }
 0x16e   :  { %v229_v11 = vsub.s32 0, %v5153_v9 }
 0x170   :  { %1529 = vmatpush1.bf16.msra.mxu0 %v4473_v46  ;;  %v5159_v46 = vld [vmem:[%s5320_s5] sm:$0xff] }
 0x171   :  { %3996 = vmatprep.subr.bf16.mxu0 %v4476_v33  ;;  %v230_v12 = vrot.slane %v5159_v46, %v229_v11 }
 0x173   :  { %1547 = vmatmul.mubr.bf16.vlgmr.msra.gmra.mrb[0].mxu0 %v1169_v14 }
 0x174   :  { %1556 = vmatprep.mubr.bf16.mxu0 %v4917_v2  ;;  %3997 = vmatpush3.bf16.msra.mxu0 %v4477_v34 }
 0x175   :  { %3998 = vmatprep.subr.bf16.mxu0 %v4478_v35 }
 0x178   :  { %3999 = vmatpush3.bf16.msra.mxu0 %v4479_v36 }
 0x179   :  { %4000 = vmatprep.subr.bf16.mxu0 %v4481_v38 }
 0x17b   :  { %1557 = vmatmul.mubr.bf16.gmra.mrb[4].mxu0 %v1172_v18 }
 0x17c   :  { %4001 = vmatpush3.bf16.msra.mxu0 %v4482_v39 }
 0x17d   :  { %4002 = vmatprep.subr.bf16.mxu0 %v4484_v41 }
 0x180   :  { %4003 = vmatpush3.bf16.msra.mxu0 %v4485_v44 }
 0x181   :  { %4004 = vmatprep.subr.bf16.mxu0 %v4487_v47 }
 0x184   :  { %4005 = vmatpush3.bf16.msra.mxu0 %v4488_v48 }
 0x185   :  { %4006 = vmatprep.subr.bf16.mxu0 %v4490_v50 }
 0x186   :  { %v5113_v19 = vpop.f32.mrb[0].mxu1 }
 0x187   :  { %v5115_v20 = vpop.f32.mrb[1].mxu1 }
 0x188   :  { %v5117_v21 = vpop.f32.mrb[2].mxu1  ;;  %4007 = vmatpush3.bf16.msra.mxu0 %v4491_v51 }
 0x189   :  { %v5119_v22 = vpop.f32.mrb[3].mxu1  ;;  %4008 = vmatprep.subr.bf16.mxu0 %v4493_v55 }
 0x18c   :  { %4009 = vmatpush3.bf16.msra.mxu0 %v4494_v57 }
 0x18d   :  { %4010 = vmatprep.subr.bf16.mxu0 %v4496_v60 }
 0x18e   :  { %v5121_v24 = vpop.f32.mrb[4].mxu1 }
 0x18f   :  { %v5123_v25 = vpop.f32.mrb[5].mxu1 }
 0x190   :  { %v5125_v10 = vpop.f32.mrb[6].mxu1  ;;  %4011 = vmatpush3.bf16.msra.mxu0 %v4497_v61 }
 0x191   :  { %v5127_v26 = vpop.f32.mrb[7].mxu1 }
 0x1b6   :  { %v5129_v16 = vpop.f32.mrb[8].mxu0 }
 0x1b7   :  { %v5131_v27 = vpop.f32.mrb[9].mxu0 }
 0x1b8   :  { %v5133_v28 = vpop.f32.mrb[10].mxu0 }
 0x1b9   :  { %v5135_v29 = vpop.f32.mrb[11].mxu0 }
 0x1be   :  { %v5137_v30 = vpop.f32.mrb[12].mxu0 }
 0x1bf   :  { %v5139_v31 = vpop.f32.mrb[13].mxu0 }
 0x1c0   :  { %v5141_v23 = vpop.f32.mrb[14].mxu0 }
 0x1c1   :  { %v5143_v32 = vpop.f32.mrb[15].mxu0 }
 0x1e6   :  { %v5145_v52 = vpop.f32.mrb[16].mxu0 }
 0x1e7   :  { %v1078_v53 = vpop.f32.mrb[17].mxu0 }
 0x1e8   :  { %v5147_v56 = vpop.f32.mrb[18].mxu0 }
 0x1e9   :  { %v1081_v58 = vpop.f32.mrb[19].mxu0 }
 0x1ee   :  { %v5149_v62 = vpop.f32.mrb[20].mxu0 }
 0x1ef   :  { %v1086_v63 = vpop.f32.mrb[21].mxu0 }
 0x1f0   :  { %v5151_v4 = vpop.f32.mrb[22].mxu0 }
 0x1f1   :  { %v1089_v5 = vpop.f32.mrb[23].mxu0 }
 0x246   :  { %v1548_v13 = vpop.f32.mrb[0].mxu0 }
 0x247   :  { %v4170_v14 = vadd.f32 %v1548_v13, %v230_v12  ;;  %v5162_v15 = vpop.f32.mrb[1].mxu0 }
 0x248   :  { %v1552_v17 = vpop.f32.mrb[2].mxu0 }
 0x249   :  { %v3804_v18 = vmul.f32 -1.442695, %v4170_v14  ;;  %v4172_v33 = vadd.f32 %v1552_v17, %v230_v12  ;;  %v5164_v34 = vpop.f32.mrb[3].mxu0 }
 0x24b   :  { %4692 = vpow2.f32 %v3804_v18  ;;  %v3805_v35 = vmul.f32 -1.442695, %v4172_v33  ;;  %v4500_v33 = vld [vmem:[#allocation7 + $0x180] ss:$8 sps:$4 sm:$0xff]  }
 0x24d   :  { %4694 = vpow2.f32 %v3805_v35 }
 0x24e   :  { %v1558_v36 = vpop.f32.mrb[4].mxu0 }
 0x24f   :  { %v4174_v37 = vadd.f32 %v1558_v36, %v230_v12  ;;  %v5166_v38 = vpop.f32.mrb[5].mxu0 }
 0x250   :  { %v1562_v39 = vpop.f32.mrb[6].mxu0 }
 0x251   :  { %v3806_v40 = vmul.f32 -1.442695, %v4174_v37  ;;  %v4176_v41 = vadd.f32 %v1562_v39, %v230_v12  ;;  %v5168_v44 = vpop.f32.mrb[7].mxu0 }
 0x253   :  { %4696 = vpow2.f32 %v3806_v40  ;;  %v3807_v45 = vmul.f32 -1.442695, %v4176_v41  ;;  %v4505_v41 = vld [vmem:[#allocation7 + $0x194] ss:$8 sps:$4 sm:$0xff]  }
 0x255   :  { %v4693_v47 = vpop.eup %4692  ;;  %4698 = vpow2.f32 %v3807_v45  ;;  %v4503_v45 = vld [vmem:[#allocation7 + $0x190] ss:$8 sps:$4 sm:$0xff]  }
 0x256   :  { %v1583_v48 = vadd.f32 1.0, %v4693_v47  ;;  %v4508_v47 = vld [vmem:[#allocation7 + $0x1a4] ss:$8 sps:$4 sm:$0xff]  }
 0x257   :  { %v4695_v49 = vpop.eup %4694 }
 0x258   :  { %4700 = vrcp.f32 %v1583_v48  ;;  %v1584_v50 = vadd.f32 1.0, %v4695_v49  ;;  %v4506_v48 = vld [vmem:[#allocation7 + $0x1a0] ss:$8 sps:$4 sm:$0xff]   ;;  %v4511_v49 = vld [vmem:[#allocation7 + $0x1b4] ss:$8 sps:$4 sm:$0xff]  }
 0x25a   :  { %4702 = vrcp.f32 %v1584_v50  ;;  %v4509_v50 = vld [vmem:[#allocation7 + $0x1b0] ss:$8 sps:$4 sm:$0xff]  }
 0x25d   :  { %v4697_v51 = vpop.eup %4696 }
 0x25e   :  { %v1585_v53 = vadd.f32 1.0, %v4697_v51  ;;  %v4514_v51 = vld [vmem:[#allocation7 + $0x1c4] ss:$8 sps:$4 sm:$0xff]  }
 0x25f   :  { %v4699_v54 = vpop.eup %4698 }
 0x260   :  { %4704 = vrcp.f32 %v1585_v53  ;;  %v1586_v55 = vadd.f32 1.0, %v4699_v54  ;;  %v4512_v53 = vld [vmem:[#allocation7 + $0x1c0] ss:$8 sps:$4 sm:$0xff]   ;;  %v4517_v54 = vld [vmem:[#allocation7 + $0x1d4] ss:$8 sps:$4 sm:$0xff]  }
 0x262   :  { %v4701_v57 = vpop.eup %4700  ;;  %4706 = vrcp.f32 %v1586_v55  ;;  %v4515_v55 = vld [vmem:[#allocation7 + $0x1d0] ss:$8 sps:$4 sm:$0xff]  }
 0x263   :  { %v1623_v58 = vmul.f32 %v4701_v57, %v5060_v42  ;;  %v4520_v57 = vld [vmem:[#allocation7 + $0x1e4] ss:$8 sps:$4 sm:$0xff]  }
 0x264   :  { %v4703_v59 = vpop.eup %4702 }
 0x265   :  { %1627 = vst [vmem:[#allocation2 + $0x1] sm:$0xff] %v1623_v58  ;;  %v1624_v60 = vmul.f32 %v4703_v59, %v5065_v43  ;;  %v4523_v59 = vld [vmem:[#allocation7 + $0x1f4] ss:$8 sps:$4 sm:$0xff]  }
 0x267   :  { %1628 = vst [vmem:[#allocation2 + $0x9] sm:$0xff] %v1624_v60  ;;  %v1644_v61 = vpack.c.bf16 %v1624_v60, %v1623_v58  ;;  %v4518_v58 = vld [vmem:[#allocation7 + $0x1e0] ss:$8 sps:$4 sm:$0xff]   ;;  %v4521_v60 = vld [vmem:[#allocation7 + $0x1f0] ss:$8 sps:$4 sm:$0xff]  }
 0x269   :  { %1873 = vmatprep.mubr.bf16.mxu0 %v1644_v61  ;;  %v4526_v61 = vld [vmem:[#allocation7 + $0x204] ss:$8 sps:$4 sm:$0xff]  }
 0x26a   :  { %v4705_v63 = vpop.eup %4704 }
 0x26b   :  { %v1625_v0 = vmul.f32 %v4705_v63, %v5072_v1  ;;  %v4524_v63 = vld [vmem:[#allocation7 + $0x200] ss:$8 sps:$4 sm:$0xff]  }
 0x26c   :  { %v4707_v5 = vpop.eup %4706  ;;  %v1631_v7 = vld [vmem:[#allocation2] sm:$0xff] }
 0x26d   :  { %1629 = vst [vmem:[#allocation2 + $0x19] sm:$0xff] %v1625_v0  ;;  %v1626_v6 = vmul.f32 %v4707_v5, %v5078_v3  ;;  %v4527_v5 = vld [vmem:[#allocation7 + $0x210] ss:$8 sps:$4 sm:$0xff]  }
 0x26e   :  { %v1639_v8 = vld [vmem:[#allocation2 + $0x2] sm:$0xff]  ;;  %v1640_v11 = vld [vmem:[#allocation2 + $0xa] sm:$0xff] }
 0x26f   :  { %v1632_v12 = vld [vmem:[#allocation2 + $0x8] sm:$0xff]  ;;  %1630 = vst [vmem:[#allocation2 + $0x21] sm:$0xff] %v1626_v6  ;;  %v1645_v13 = vpack.c.bf16 %v1640_v11, %v1639_v8  ;;  %v1647_v17 = vpack.c.bf16 %v1626_v6, %v1625_v0  ;;  %v4532_v6 = vld [vmem:[#allocation7 + $0x224] ss:$8 sps:$4 sm:$0xff]  }
 0x270   :  { %v1643_v14 = vpack.c.bf16 %v1632_v12, %v1631_v7  ;;  %v4529_v0 = vld [vmem:[#allocation7 + $0x214] ss:$8 sps:$4 sm:$0xff]   ;;  %v4530_v7 = vld [vmem:[#allocation7 + $0x220] ss:$8 sps:$4 sm:$0xff]   ;;  %v4533_v11 = vld [vmem:[#allocation7 + $0x230] ss:$8 sps:$4 sm:$0xff]  }
 0x271   :  { %4126 = vmatprep.mubr.bf16.mxu1 %v1645_v13  ;;  %v4535_v8 = vld [vmem:[#allocation7 + $0x234] ss:$8 sps:$4 sm:$0xff]   ;;  %v4538_v12 = vld [vmem:[#allocation7 + $0x244] ss:$8 sps:$4 sm:$0xff]   ;;  %v4536_v13 = vld [vmem:[#allocation7 + $0x240] ss:$8 sps:$4 sm:$0xff]  }
 0x272   :  { %1874 = vmatmul.mubr.bf16.vlgmr.msra.gmra.mrb[24].mxu0 %v1643_v14  ;;  %v4541_v14 = vld [vmem:[#allocation7 + $0x254] ss:$8 sps:$4 sm:$0xff]  }
 0x273   :  { %1881 = vmatprep.mubr.bf16.mxu0 %v1647_v17  ;;  %v4539_v17 = vld [vmem:[#allocation7 + $0x250] ss:$8 sps:$4 sm:$0xff]  }
 0x274   :  { %v1633_v18 = vld [vmem:[#allocation2 + $0x18] sm:$0xff] }
 0x276   :  { %v1641_v35 = vld [vmem:[#allocation2 + $0x1a] sm:$0xff]  ;;  %v1642_v36 = vld [vmem:[#allocation2 + $0x22] sm:$0xff] }
 0x277   :  { %v1634_v37 = vld [vmem:[#allocation2 + $0x20] sm:$0xff]  ;;  %v1648_v39 = vpack.c.bf16 %v1642_v36, %v1641_v35 }
 0x278   :  { %v1646_v40 = vpack.c.bf16 %v1634_v37, %v1633_v18  ;;  %v4544_v18 = vld [vmem:[#allocation7 + $0x264] ss:$8 sps:$4 sm:$0xff]   ;;  %v4547_v35 = vld [vmem:[#allocation7 + $0x274] ss:$8 sps:$4 sm:$0xff]   ;;  %v4545_v36 = vld [vmem:[#allocation7 + $0x270] ss:$8 sps:$4 sm:$0xff]  }
 0x279   :  { %4127 = vmatmul.mubr.bf16.vlgmr.msra.gmra.mrb[16].mxu1 %v1648_v39  ;;  %v4550_v37 = vld [vmem:[#allocation7 + $0x284] ss:$8 sps:$4 sm:$0xff]   ;;  %v233_v39 = vsub.s32 1, %v5153_v9 }
 0x27a   :  { %1882 = vmatmul.mubr.bf16.gmra.mrb[28].mxu0 %v1646_v40  ;;  %2287 = vmatpush1.bf16.msra.mxu1 %v4500_v33  ;;  %v4542_v33 = vld [vmem:[#allocation7 + $0x260] ss:$8 sps:$4 sm:$0xff]  }
 0x27b   :  { %2288 = vmatprep.subr.bf16.mxu1 %v4505_v41  ;;  %v234_v40 = vrot.slane %v5159_v46, %v233_v39 }
 0x27d   :  { %v4171_v41 = vadd.f32 %v5162_v15, %v234_v40  ;;  %v237_v15 = vsub.s32 2, %v5153_v9 }
 0x27e   :  { %2289 = vmatpush1.bf16.msra.mxu1 %v4503_v45  ;;  %v4173_v45 = vadd.f32 %v5164_v34, %v234_v40 }
 0x27f   :  { %2290 = vmatprep.subr.bf16.mxu1 %v4508_v47  ;;  %v4175_v47 = vadd.f32 %v5166_v38, %v234_v40 }
 0x282   :  { %2291 = vmatpush1.bf16.msra.mxu1 %v4506_v48  ;;  %v4177_v48 = vadd.f32 %v5168_v44, %v234_v40 }
 0x283   :  { %2292 = vmatprep.subr.bf16.mxu1 %v4511_v49  ;;  %v3808_v49 = vmul.f32 -1.442695, %v4171_v41 }
 0x285   :  { %4708 = vpow2.f32 %v3808_v49 }
 0x286   :  { %2293 = vmatpush1.bf16.msra.mxu1 %v4509_v50  ;;  %v3809_v50 = vmul.f32 -1.442695, %v4173_v45 }
 0x287   :  { %2294 = vmatprep.subr.bf16.mxu1 %v4514_v51  ;;  %v3810_v51 = vmul.f32 -1.442695, %v4175_v47 }
 0x288   :  { %4710 = vpow2.f32 %v3809_v50 }
 0x289   :  { %4712 = vpow2.f32 %v3810_v51 }
 0x28a   :  { %2295 = vmatpush1.bf16.msra.mxu1 %v4512_v53  ;;  %v3811_v53 = vmul.f32 -1.442695, %v4177_v48 }
 0x28b   :  { %2296 = vmatprep.subr.bf16.mxu1 %v4517_v54 }
 0x28c   :  { %4714 = vpow2.f32 %v3811_v53 }
 0x28e   :  { %2297 = vmatpush1.bf16.msra.mxu1 %v4515_v55 }
 0x28f   :  { %2298 = vmatprep.subr.bf16.mxu1 %v4520_v57  ;;  %v4709_v55 = vpop.eup %4708 }
 0x290   :  { %v1611_v44 = vadd.f32 1.0, %v4709_v55 }
 0x292   :  { %2299 = vmatpush1.bf16.msra.mxu1 %v4518_v58  ;;  %v4711_v58 = vpop.eup %4710  ;;  %4716 = vrcp.f32 %v1611_v44 }
 0x293   :  { %2300 = vmatprep.subr.bf16.mxu1 %v4523_v59 }
 0x296   :  { %2301 = vmatpush1.bf16.msra.mxu1 %v4521_v60  ;;  %v4713_v60 = vpop.eup %4712 }
 0x297   :  { %2302 = vmatprep.subr.bf16.mxu1 %v4526_v61  ;;  %v4715_v61 = vpop.eup %4714 }
 0x29a   :  { %2303 = vmatpush1.bf16.msra.mxu1 %v4524_v63 }
 0x29b   :  { %2304 = vmatprep.subr.bf16.mxu1 %v4529_v0  ;;  %v1612_v0 = vadd.f32 1.0, %v4711_v58 }
 0x29d   :  { %4718 = vrcp.f32 %v1612_v0 }
 0x29e   :  { %2305 = vmatpush1.bf16.msra.mxu1 %v4527_v5  ;;  %v238_v5 = vrot.slane %v5159_v46, %v237_v15 }
 0x29f   :  { %2306 = vmatprep.subr.bf16.mxu1 %v4532_v6  ;;  %v1613_v6 = vadd.f32 1.0, %v4713_v60 }
 0x2a0   :  { %v932_v49 = vadd.f32 %v5125_v10, %v238_v5 }
 0x2a1   :  { %4720 = vrcp.f32 %v1613_v6 }
 0x2a2   :  { %2307 = vmatpush1.bf16.msra.mxu1 %v4530_v7  ;;  %v1614_v7 = vadd.f32 1.0, %v4715_v61 }
 0x2a3   :  { %2308 = vmatprep.subr.bf16.mxu1 %v4535_v8 }
 0x2a4   :  { %4722 = vrcp.f32 %v1614_v7 }
 0x2a6   :  { %2309 = vmatpush1.bf16.msra.mxu1 %v4533_v11 }
 0x2a7   :  { %2310 = vmatprep.subr.bf16.mxu1 %v4538_v12 }
 0x2aa   :  { %2311 = vmatpush1.bf16.msra.mxu1 %v4536_v13 }
 0x2ab   :  { %2312 = vmatprep.subr.bf16.mxu1 %v4541_v14  ;;  %v918_v14 = vadd.f32 %v5113_v19, %v238_v5 }
 0x2ae   :  { %2313 = vmatpush1.bf16.msra.mxu1 %v4539_v17 }
 0x2af   :  { %2314 = vmatprep.subr.bf16.mxu1 %v4544_v18 }
 0x2b2   :  { %2315 = vmatpush1.bf16.msra.mxu1 %v4542_v33 }
 0x2b3   :  { %2316 = vmatprep.subr.bf16.mxu1 %v4547_v35 }
 0x2b6   :  { %2317 = vmatpush1.bf16.msra.mxu1 %v4545_v36  ;;  %v922_v36 = vadd.f32 %v5117_v21, %v238_v5 }
 0x2b7   :  { %2339 = vmatprep.subr.bf16.mxu1 %v4550_v37  ;;  %v928_v37 = vadd.f32 %v5121_v24, %v238_v5 }
 0x345   :  { %v4012_v54 = vpop.f32.mrb[24].mxu0 }
 0x346   :  { %v4013_v57 = vpop.f32.mrb[25].mxu0 }
 0x347   :  { %v4014_v59 = vadd.f32 %v4013_v57, %v4012_v54  ;;  %v4015_v34 = vpop.f32.mrb[26].mxu0  ;;  %v4717_v54 = vpop.eup %4716 }
 0x348   :  { %v4016_v38 = vpop.f32.mrb[27].mxu0  ;;  %v4719_v21 = vpop.eup %4718  ;;  %v1947_v57 = vsub.f32 1.0, %v4717_v54 }
 0x349   :  { %v4017_v63 = vadd.f32 %v4016_v38, %v4015_v34  ;;  %v4721_v24 = vpop.eup %4720 }
 0x34a   :  { %v4723_v55 = vpop.eup %4722  ;;  %v1949_v58 = vsub.f32 1.0, %v4721_v24  ;;  %v1951_v34 = vmul.f32 %v1947_v57, %v5060_v42 }
 0x34b   :  { %v1950_v60 = vsub.f32 1.0, %v4723_v55 }
 0x34c   :  { %v4128_v8 = vpop.f32.mrb[16].mxu1  ;;  %v1953_v44 = vmul.f32 %v1949_v58, %v5072_v1 }
 0x34d   :  { %v4018_v11 = vpop.f32.mrb[28].mxu0  ;;  %v1924_v12 = vpop.f32.mrb[17].mxu1 }
 0x34e   :  { %v4019_v13 = vpop.f32.mrb[29].mxu0  ;;  %v1925_v17 = vadd.f32 %v4014_v59, %v1924_v12  ;;  %v4129_v33 = vpop.f32.mrb[18].mxu1  ;;  %v1948_v59 = vsub.f32 1.0, %v4719_v21 }
 0x34f   :  { %v4020_v18 = vadd.f32 %v4019_v13, %v4018_v11  ;;  %v4021_v35 = vpop.f32.mrb[30].mxu0  ;;  %v1927_v39 = vpop.f32.mrb[19].mxu1 }
 0x350   :  { %v4022_v40 = vpop.f32.mrb[31].mxu0  ;;  %v1939_v41 = vadd.f32 %v1925_v17, %v918_v14  ;;  %v1928_v47 = vadd.f32 %v4017_v63, %v1927_v39  ;;  %v1952_v6 = vmul.f32 %v1948_v59, %v5065_v43  ;;  %v4548_v43 = vld [vmem:[#allocation7 + $0x280] ss:$8 sps:$4 sm:$0xff]  }
 0x351   :  { %v1933_v45 = vadd.f32 %v4128_v8, %v4020_v18  ;;  %v4023_v48 = vadd.f32 %v4022_v40, %v4021_v35  ;;  %v1954_v8 = vmul.f32 %v1950_v60, %v5078_v3  ;;  %v4553_v18 = vld [vmem:[#allocation7 + $0x294] ss:$8 sps:$4 sm:$0xff]   ;;  %v4551_v35 = vld [vmem:[#allocation7 + $0x290] ss:$8 sps:$4 sm:$0xff]   ;;  %v4554_v39 = vld [vmem:[#allocation7 + $0x2a0] ss:$8 sps:$4 sm:$0xff]  }
 0x352   :  { %4724 = vtanh.f32 %v1939_v41  ;;  %v1940_v50 = vadd.f32 %v1928_v47, %v922_v36  ;;  %v4556_v36 = vld [vmem:[#allocation7 + $0x2a4] ss:$8 sps:$4 sm:$0xff]   ;;  %v4557_v47 = vld [vmem:[#allocation7 + $0x2b0] ss:$8 sps:$4 sm:$0xff]  }
 0x353   :  { %v1941_v19 = vadd.f32 %v1933_v45, %v928_v37  ;;  %v1936_v51 = vadd.f32 %v4129_v33, %v4023_v48  ;;  %v4559_v45 = vld [vmem:[#allocation7 + $0x2b4] ss:$8 sps:$4 sm:$0xff]   ;;  %v4562_v48 = vld [vmem:[#allocation7 + $0x2c4] ss:$8 sps:$4 sm:$0xff]  }
 0x354   :  { %v4573_v60 = vld [vmem:[#allocation9 + $0xc0] sm:$0xff]  }
 0x355   :  { %4726 = vtanh.f32 %v1941_v19  ;;  %v1942_v53 = vadd.f32 %v1936_v51, %v932_v49  ;;  %v4560_v49 = vld [vmem:[#allocation7 + $0x2c0] ss:$8 sps:$4 sm:$0xff]   ;;  %v4565_v19 = vld [vmem:[#allocation7 + $0x2d4] ss:$8 sps:$4 sm:$0xff]   ;;  %v4568_v51 = vld [vmem:[#allocation7 + $0x2e4] ss:$8 sps:$4 sm:$0xff]  }
 0x356   :  { %4728 = vtanh.f32 %v1940_v50  ;;  %v4563_v50 = vld [vmem:[#allocation7 + $0x2d0] ss:$8 sps:$4 sm:$0xff]  }
 0x357   :  { %4730 = vtanh.f32 %v1942_v53  ;;  %v4566_v53 = vld [vmem:[#allocation7 + $0x2e0] ss:$8 sps:$4 sm:$0xff]  }
 0x35c   :  { %v4725_v15 = vpop.eup %4724 }
 0x35d   :  { %v1955_v10 = vmul.f32 %v4725_v15, %v4717_v54  ;;  %v4571_v54 = vld [vmem:[#allocation7 + $0x2f4] ss:$8 sps:$4 sm:$0xff]  }
 0x35f   :  { %v4727_v38 = vpop.eup %4726  ;;  %v5188_v63 = vadd.f32 %v1955_v10, %v1951_v34  ;;  %v4572_v34 = vld [vmem:[#allocation9 + $0x100] sm:$0xff]   ;;  %v4574_v10 = vld [vmem:[#allocation9 + $0x108] sm:$0xff]  }
 0x360   :  { %v4729_v61 = vpop.eup %4728  ;;  %v1957_v0 = vmul.f32 %v4727_v38, %v4721_v24  ;;  %4034 = vmatprep.subr.bf16.mxu0 %v4572_v34  ;;  %v4575_v38 = vld [vmem:[#allocation9 + $0xc8] sm:$0xff]  }
 0x361   :  { %v4731_v5 = vpop.eup %4730  ;;  %v1956_v7 = vmul.f32 %v4729_v61, %v4719_v21  ;;  %1963 = vst [vmem:[#allocation2 + $0x1] sm:$0xff] %v5188_v63  ;;  %v4569_v21 = vld [vmem:[#allocation7 + $0x2f0] ss:$8 sps:$4 sm:$0xff]   ;;  %4035 = vmatpush3.bf16.msra.mxu0 %v4573_v60  ;;  %v4576_v61 = vld [vmem:[#allocation9 + $0x140] sm:$0xff]  }
 0x362   :  { %v5193_v11 = vadd.f32 %v1957_v0, %v1953_v44  ;;  %v1958_v42 = vmul.f32 %v4731_v5, %v4723_v55  ;;  %4036 = vmatprep.subr.bf16.mxu0 %v4574_v10  ;;  %v4577_v44 = vld [vmem:[#allocation9 + $0x110] sm:$0xff]   ;;  %v4579_v5 = vld [vmem:[#allocation9 + $0x148] sm:$0xff]  }
 0x363   :  { %v5195_v12 = vadd.f32 %v1956_v7, %v1952_v6  ;;  %v4578_v0 = vld [vmem:[#allocation9 + $0xd0] sm:$0xff]   ;;  %v4580_v6 = vld [vmem:[#allocation9 + $0x118] sm:$0xff]  }
 0x364   :  { %1965 = vst [vmem:[#allocation2 + $0x19] sm:$0xff] %v5193_v11  ;;  %v5198_v13 = vadd.f32 %v1958_v42, %v1954_v8  ;;  %v4581_v7 = vld [vmem:[#allocation9 + $0xd8] sm:$0xff]   ;;  %v4582_v8 = vld [vmem:[#allocation9 + $0x150] sm:$0xff]   ;;  %v4583_v42 = vld [vmem:[#allocation9 + $0x120] sm:$0xff]  }
 0x365   :  { %1964 = vst [vmem:[#allocation2 + $0x9] sm:$0xff] %v5195_v12  ;;  %v1992_v1 = vpack.c.bf16 %v5195_v12, %v5188_v63  ;;  %4037 = vmatpush3.bf16.msra.mxu0 %v4575_v38 }
 0x366   :  { %1966 = vst [vmem:[#allocation2 + $0x21] sm:$0xff] %v5198_v13  ;;  %v1995_v33 = vpack.c.bf16 %v5198_v13, %v5193_v11  ;;  %4038 = vmatprep.subr.bf16.mxu0 %v4577_v44 }
 0x367   :  { %2318 = vmatprep.mubr.bf16.mxu1 %v1992_v1  ;;  %v4584_v1 = vld [vmem:[#allocation9 + $0xe0] sm:$0xff]  }
 0x368   :  { %v1979_v3 = vld [vmem:[#allocation2] sm:$0xff] }
 0x369   :  { %4039 = vmatpush3.bf16.msra.mxu0 %v4578_v0 }
 0x36a   :  { %4040 = vmatprep.subr.bf16.mxu0 %v4580_v6 }
 0x36b   :  { %v1981_v40 = vld [vmem:[#allocation2 + $0x18] sm:$0xff] }
 0x36c   :  { %v1980_v14 = vld [vmem:[#allocation2 + $0x8] sm:$0xff] }
 0x36d   :  { %v1991_v17 = vpack.c.bf16 %v1980_v14, %v1979_v3  ;;  %v1982_v37 = vld [vmem:[#allocation2 + $0x20] sm:$0xff]  ;;  %v1988_v55 = vld [vmem:[#allocation2 + $0xa] sm:$0xff]  ;;  %4041 = vmatpush3.bf16.msra.mxu0 %v4581_v7  ;;  %v4586_v3 = vld [vmem:[#allocation9 + $0x128] sm:$0xff]  }
 0x36e   :  { %v1994_v41 = vpack.c.bf16 %v1982_v37, %v1981_v40  ;;  %v1987_v24 = vld [vmem:[#allocation2 + $0x2] sm:$0xff]  ;;  %v1989_v58 = vld [vmem:[#allocation2 + $0x1a] sm:$0xff]  ;;  %4042 = vmatprep.subr.bf16.mxu0 %v4583_v42 }
 0x36f   :  { %2319 = vmatmul.mubr.bf16.vlgmr.msra.gmra.mrb[20].mxu1 %v1991_v17  ;;  %v1993_v57 = vpack.c.bf16 %v1988_v55, %v1987_v24  ;;  %v1990_v15 = vld [vmem:[#allocation2 + $0x22] sm:$0xff]  ;;  %v4587_v14 = vld [vmem:[#allocation9 + $0xe8] sm:$0xff]   ;;  %v4588_v17 = vld [vmem:[#allocation9 + $0x160] sm:$0xff]  }
 0x370   :  { %2340 = vmatpush1.bf16.msra.mxu1 %v4548_v43  ;;  %2328 = vmatprep.mubr.bf16.mxu1 %v1995_v33  ;;  %v1996_v59 = vpack.c.bf16 %v1990_v15, %v1989_v58  ;;  %v4585_v43 = vld [vmem:[#allocation9 + $0x158] sm:$0xff]   ;;  %v4590_v33 = vld [vmem:[#allocation9 + $0xf0] sm:$0xff]  }
 0x371   :  { %2341 = vmatprep.subr.bf16.mxu1 %v4553_v18  ;;  %4043 = vmatpush3.bf16.msra.mxu0 %v4584_v1  ;;  %v4589_v18 = vld [vmem:[#allocation9 + $0x130] sm:$0xff]   ;;  %v4593_v37 = vld [vmem:[#allocation9 + $0xf8] sm:$0xff]  }
 0x372   :  { %4044 = vmatprep.subr.bf16.mxu0 %v4586_v3  ;;  %v4595_v40 = vld [vmem:[#allocation9 + $0x178] sm:$0xff]  }
 0x374   :  { %2342 = vmatpush1.bf16.msra.mxu1 %v4551_v35  ;;  %v4591_v35 = vld [vmem:[#allocation9 + $0x168] sm:$0xff]  }
 0x375   :  { %2343 = vmatprep.subr.bf16.mxu1 %v4556_v36  ;;  %4045 = vmatpush3.bf16.msra.mxu0 %v4587_v14  ;;  %v4592_v36 = vld [vmem:[#allocation9 + $0x138] sm:$0xff]  }
 0x376   :  { %4046 = vmatprep.subr.bf16.mxu0 %v4589_v18 }
 0x377   :  { %2329 = vmatmul.mubr.bf16.gmra.mrb[24].mxu1 %v1994_v41  ;;  %v4598_v41 = vld [vmem:[#allocation7 + $0x304] ss:$8 sps:$4 sm:$0xff]  }
 0x378   :  { %2344 = vmatpush1.bf16.msra.mxu1 %v4554_v39  ;;  %2371 = vmatprep.mubr.bf16.mxu1 %v4917_v2  ;;  %v4594_v39 = vld [vmem:[#allocation9 + $0x170] sm:$0xff]  }
 0x379   :  { %2345 = vmatprep.subr.bf16.mxu1 %v4559_v45  ;;  %4047 = vmatpush3.bf16.msra.mxu0 %v4590_v33  ;;  %v241_v45 = vsub.s32 3, %v5153_v9 }
 0x37a   :  { %4048 = vmatprep.subr.bf16.mxu0 %v4592_v36 }
 0x37c   :  { %2346 = vmatpush1.bf16.msra.mxu1 %v4557_v47  ;;  %v245_v47 = vsub.s32 4, %v5153_v9 }
 0x37d   :  { %2347 = vmatprep.subr.bf16.mxu1 %v4562_v48  ;;  %4049 = vmatpush3.bf16.msra.mxu0 %v4593_v37  ;;  %v242_v48 = vrot.slane %v5159_v46, %v241_v45 }
 0x37f   :  { %v934_v10 = vadd.f32 %v5127_v26, %v242_v48 }
 0x380   :  { %2348 = vmatpush1.bf16.msra.mxu1 %v4560_v49  ;;  %v246_v49 = vrot.slane %v5159_v46, %v245_v47 }
 0x381   :  { %2349 = vmatprep.subr.bf16.mxu1 %v4565_v19  ;;  %v920_v19 = vadd.f32 %v5115_v20, %v242_v48  ;;  %v930_v20 = vadd.f32 %v5123_v25, %v242_v48 }
 0x382   :  { %v975_v24 = vadd.f32 %v5133_v28, %v246_v49 }
 0x384   :  { %2350 = vmatpush1.bf16.msra.mxu1 %v4563_v50  ;;  %v971_v50 = vadd.f32 %v5129_v16, %v246_v49  ;;  %v981_v16 = vadd.f32 %v5137_v30, %v246_v49 }
 0x385   :  { %2351 = vmatprep.subr.bf16.mxu1 %v4568_v51 }
 0x388   :  { %2352 = vmatpush1.bf16.msra.mxu1 %v4566_v53  ;;  %v924_v53 = vadd.f32 %v5119_v22, %v242_v48 }
 0x389   :  { %2353 = vmatprep.subr.bf16.mxu1 %v4571_v54 }
 0x38c   :  { %2354 = vmatpush1.bf16.msra.mxu1 %v4569_v21 }
 0x38d   :  { %4130 = vmatprep.subr.bf16.mxu1 %v4576_v61 }
 0x38f   :  { %2372 = vmatmul.mubr.bf16.vlgmr.msra.gmra.mrb[20].mxu1 %v1993_v57 }
 0x390   :  { %2381 = vmatprep.mubr.bf16.mxu1 %v4917_v2  ;;  %4131 = vmatpush3.bf16.msra.mxu1 %v4576_v61  ;;  %v985_v61 = vadd.f32 %v5141_v23, %v246_v49 }
 0x391   :  { %4132 = vmatprep.subr.bf16.mxu1 %v4579_v5 }
 0x394   :  { %4133 = vmatpush3.bf16.msra.mxu1 %v4579_v5 }
 0x395   :  { %4134 = vmatprep.subr.bf16.mxu1 %v4582_v8 }
 0x397   :  { %2382 = vmatmul.mubr.bf16.gmra.mrb[24].mxu1 %v1996_v59 }
 0x398   :  { %4135 = vmatpush3.bf16.msra.mxu1 %v4582_v8 }
 0x399   :  { %4136 = vmatprep.subr.bf16.mxu1 %v4585_v43 }
 0x39c   :  { %4137 = vmatpush3.bf16.msra.mxu1 %v4585_v43 }
 0x39d   :  { %4138 = vmatprep.subr.bf16.mxu1 %v4588_v17 }
 0x3a0   :  { %4139 = vmatpush3.bf16.msra.mxu1 %v4588_v17 }
 0x3a1   :  { %4140 = vmatprep.subr.bf16.mxu1 %v4591_v35 }
 0x3a4   :  { %4141 = vmatpush3.bf16.msra.mxu1 %v4591_v35 }
 0x3a5   :  { %4142 = vmatprep.subr.bf16.mxu1 %v4594_v39 }
 0x3a8   :  { %4143 = vmatpush3.bf16.msra.mxu1 %v4594_v39 }
 0x3a9   :  { %4144 = vmatprep.subr.bf16.mxu1 %v4595_v40 }
 0x3ac   :  { %4145 = vmatpush3.bf16.msra.mxu1 %v4595_v40 }
 0x3ad   :  { %3112 = vmatprep.subr.bf16.mxu1 %v4598_v41 }
 0x462   :  { %v2373_v51 = vpop.f32.mrb[20].mxu1 }
 0x463   :  { %v2392_v54 = vadd.f32 %v2373_v51, %v920_v19  ;;  %v2375_v21 = vpop.f32.mrb[21].mxu1 }
 0x464   :  { %v5216_v55 = vadd.f32 %v2375_v21, %v971_v50  ;;  %v2377_v57 = vpop.f32.mrb[22].mxu1 }
 0x465   :  { %v3884_v58 = vmul.f32 -1.442695, %v2392_v54  ;;  %v2393_v15 = vadd.f32 %v2377_v57, %v924_v53  ;;  %v2379_v59 = vpop.f32.mrb[23].mxu1  ;;  %v4596_v54 = vld [vmem:[#allocation7 + $0x300] ss:$8 sps:$4 sm:$0xff]  }
 0x466   :  { %v5218_v34 = vadd.f32 %v2379_v59, %v975_v24  ;;  %v4601_v59 = vld [vmem:[#allocation7 + $0x314] ss:$8 sps:$4 sm:$0xff]  }
 0x467   :  { %4732 = vpow2.f32 %v3884_v58  ;;  %v3885_v60 = vmul.f32 -1.442695, %v2393_v15 }
 0x469   :  { %4734 = vpow2.f32 %v3885_v60  ;;  %v4599_v60 = vld [vmem:[#allocation7 + $0x310] ss:$8 sps:$4 sm:$0xff]  }
 0x46a   :  { %v2383_v22 = vpop.f32.mrb[24].mxu1 }
 0x46b   :  { %v2394_v38 = vadd.f32 %v2383_v22, %v930_v20  ;;  %v2385_v28 = vpop.f32.mrb[25].mxu1  ;;  %v4604_v20 = vld [vmem:[#allocation7 + $0x324] ss:$8 sps:$4 sm:$0xff]   ;;  %v4607_v22 = vld [vmem:[#allocation7 + $0x334] ss:$8 sps:$4 sm:$0xff]  }
 0x46c   :  { %v5224_v44 = vadd.f32 %v2385_v28, %v981_v16  ;;  %v2387_v0 = vpop.f32.mrb[26].mxu1  ;;  %v4602_v16 = vld [vmem:[#allocation7 + $0x320] ss:$8 sps:$4 sm:$0xff]  }
 0x46d   :  { %v3886_v5 = vmul.f32 -1.442695, %v2394_v38  ;;  %v2395_v6 = vadd.f32 %v2387_v0, %v934_v10  ;;  %v2389_v7 = vpop.f32.mrb[27].mxu1  ;;  %v4605_v10 = vld [vmem:[#allocation7 + $0x330] ss:$8 sps:$4 sm:$0xff]  }
 0x46e   :  { %v5226_v8 = vadd.f32 %v2389_v7, %v985_v61  ;;  %v4610_v38 = vld [vmem:[#allocation7 + $0x344] ss:$8 sps:$4 sm:$0xff]   ;;  %v4608_v28 = vld [vmem:[#allocation7 + $0x340] ss:$8 sps:$4 sm:$0xff]   ;;  %v4613_v61 = vld [vmem:[#allocation7 + $0x354] ss:$8 sps:$4 sm:$0xff]  }
 0x46f   :  { %4736 = vpow2.f32 %v3886_v5  ;;  %v3887_v25 = vmul.f32 -1.442695, %v2395_v6  ;;  %v4611_v0 = vld [vmem:[#allocation7 + $0x350] ss:$8 sps:$4 sm:$0xff]   ;;  %v4616_v5 = vld [vmem:[#allocation7 + $0x364] ss:$8 sps:$4 sm:$0xff]  }
 0x470   :  { %v4614_v6 = vld [vmem:[#allocation7 + $0x360] ss:$8 sps:$4 sm:$0xff]   ;;  %v4619_v7 = vld [vmem:[#allocation7 + $0x374] ss:$8 sps:$4 sm:$0xff]  }
 0x471   :  { %v4733_v42 = vpop.eup %4732  ;;  %4738 = vpow2.f32 %v3887_v25  ;;  %v4617_v25 = vld [vmem:[#allocation7 + $0x370] ss:$8 sps:$4 sm:$0xff]  }
 0x472   :  { %v2408_v30 = vadd.f32 1.0, %v4733_v42  ;;  %v4622_v42 = vld [vmem:[#allocation7 + $0x384] ss:$8 sps:$4 sm:$0xff]  }
 0x473   :  { %v4735_v1 = vpop.eup %4734 }
 0x474   :  { %4740 = vrcp.f32 %v2408_v30  ;;  %v2409_v26 = vadd.f32 1.0, %v4735_v1  ;;  %v4620_v30 = vld [vmem:[#allocation7 + $0x380] ss:$8 sps:$4 sm:$0xff]   ;;  %v4625_v1 = vld [vmem:[#allocation7 + $0x394] ss:$8 sps:$4 sm:$0xff]  }
 0x476   :  { %4742 = vrcp.f32 %v2409_v26  ;;  %v4623_v26 = vld [vmem:[#allocation7 + $0x390] ss:$8 sps:$4 sm:$0xff]  }
 0x479   :  { %v4737_v43 = vpop.eup %4736 }
 0x47a   :  { %v2410_v3 = vadd.f32 1.0, %v4737_v43  ;;  %v4628_v43 = vld [vmem:[#allocation7 + $0x3a4] ss:$8 sps:$4 sm:$0xff]  }
 0x47b   :  { %v4739_v23 = vpop.eup %4738 }
 0x47c   :  { %4744 = vrcp.f32 %v2410_v3  ;;  %v2411_v14 = vadd.f32 1.0, %v4739_v23  ;;  %v4626_v3 = vld [vmem:[#allocation7 + $0x3a0] ss:$8 sps:$4 sm:$0xff]   ;;  %v4631_v23 = vld [vmem:[#allocation7 + $0x3b4] ss:$8 sps:$4 sm:$0xff]  }
 0x47e   :  { %v4741_v17 = vpop.eup %4740  ;;  %4746 = vrcp.f32 %v2411_v14  ;;  %v4629_v14 = vld [vmem:[#allocation7 + $0x3b0] ss:$8 sps:$4 sm:$0xff]  }
 0x47f   :  { %v2448_v18 = vmul.f32 %v4741_v17, %v5188_v63  ;;  %v4634_v17 = vld [vmem:[#allocation7 + $0x3c4] ss:$8 sps:$4 sm:$0xff]  }
 0x480   :  { %v4743_v33 = vpop.eup %4742 }
 0x481   :  { %2452 = vst [vmem:[#allocation2 + $0x1] sm:$0xff] %v2448_v18  ;;  %v2449_v35 = vmul.f32 %v4743_v33, %v5195_v12  ;;  %v4637_v33 = vld [vmem:[#allocation7 + $0x3d4] ss:$8 sps:$4 sm:$0xff]  }
 0x483   :  { %2453 = vst [vmem:[#allocation2 + $0x9] sm:$0xff] %v2449_v35  ;;  %v2469_v36 = vpack.c.bf16 %v2449_v35, %v2448_v18  ;;  %v4632_v18 = vld [vmem:[#allocation7 + $0x3c0] ss:$8 sps:$4 sm:$0xff]   ;;  %v4635_v35 = vld [vmem:[#allocation7 + $0x3d0] ss:$8 sps:$4 sm:$0xff]  }
 0x485   :  { %2699 = vmatprep.mubr.bf16.mxu0 %v2469_v36  ;;  %v4640_v36 = vld [vmem:[#allocation7 + $0x3e4] ss:$8 sps:$4 sm:$0xff]  }
 0x486   :  { %v4745_v37 = vpop.eup %4744 }
 0x487   :  { %v2450_v39 = vmul.f32 %v4745_v37, %v5193_v11  ;;  %v4638_v37 = vld [vmem:[#allocation7 + $0x3e0] ss:$8 sps:$4 sm:$0xff]  }
 0x488   :  { %v4747_v40 = vpop.eup %4746  ;;  %v2456_v45 = vld [vmem:[#allocation2] sm:$0xff] }
 0x489   :  { %2454 = vst [vmem:[#allocation2 + $0x19] sm:$0xff] %v2450_v39  ;;  %v2451_v41 = vmul.f32 %v4747_v40, %v5198_v13  ;;  %v4641_v40 = vld [vmem:[#allocation7 + $0x3f0] ss:$8 sps:$4 sm:$0xff]  }
 0x48a   :  { %v2464_v47 = vld [vmem:[#allocation2 + $0x2] sm:$0xff]  ;;  %v2465_v48 = vld [vmem:[#allocation2 + $0xa] sm:$0xff] }
 0x48b   :  { %v2457_v49 = vld [vmem:[#allocation2 + $0x8] sm:$0xff]  ;;  %2455 = vst [vmem:[#allocation2 + $0x21] sm:$0xff] %v2451_v41  ;;  %v2470_v19 = vpack.c.bf16 %v2465_v48, %v2464_v47  ;;  %v2472_v51 = vpack.c.bf16 %v2451_v41, %v2450_v39  ;;  %v4646_v41 = vld [vmem:[#allocation7 + $0x404] ss:$8 sps:$4 sm:$0xff]   ;;  %v3889_v47 = vmul.f32 -1.442695, %v5218_v34 }
 0x48c   :  { %v2468_v50 = vpack.c.bf16 %v2457_v49, %v2456_v45  ;;  %v4643_v39 = vld [vmem:[#allocation7 + $0x3f4] ss:$8 sps:$4 sm:$0xff]   ;;  %v3888_v45 = vmul.f32 -1.442695, %v5216_v55  ;;  %v3890_v48 = vmul.f32 -1.442695, %v5224_v44 }
 0x48d   :  { %4146 = vmatprep.mubr.bf16.mxu1 %v2470_v19  ;;  %v3891_v49 = vmul.f32 -1.442695, %v5226_v8 }
 0x48e   :  { %2700 = vmatmul.mubr.bf16.vlgmr.msra.gmra.mrb[32].mxu0 %v2468_v50  ;;  %4748 = vpow2.f32 %v3888_v45 }
 0x48f   :  { %2707 = vmatprep.mubr.bf16.mxu0 %v2472_v51  ;;  %4750 = vpow2.f32 %v3889_v47 }
 0x490   :  { %v2458_v53 = vld [vmem:[#allocation2 + $0x18] sm:$0xff]  ;;  %4752 = vpow2.f32 %v3890_v48 }
 0x491   :  { %4754 = vpow2.f32 %v3891_v49 }
 0x492   :  { %v2466_v21 = vld [vmem:[#allocation2 + $0x1a] sm:$0xff]  ;;  %v2467_v24 = vld [vmem:[#allocation2 + $0x22] sm:$0xff] }
 0x493   :  { %v2459_v57 = vld [vmem:[#allocation2 + $0x20] sm:$0xff]  ;;  %v2473_v58 = vpack.c.bf16 %v2467_v24, %v2466_v21 }
 0x494   :  { %v2471_v15 = vpack.c.bf16 %v2459_v57, %v2458_v53 }
 0x495   :  { %4147 = vmatmul.mubr.bf16.vlgmr.msra.gmra.mrb[28].mxu1 %v2473_v58 }
 0x496   :  { %2708 = vmatmul.mubr.bf16.gmra.mrb[36].mxu0 %v2471_v15  ;;  %3113 = vmatpush1.bf16.msra.mxu1 %v4596_v54  ;;  %v249_v54 = vsub.s32 5, %v5153_v9 }
 0x497   :  { %3114 = vmatprep.subr.bf16.mxu1 %v4601_v59 }
 0x498   :  { %v4749_v50 = vpop.eup %4748  ;;  %v250_v8 = vrot.slane %v5159_v46, %v249_v54 }
 0x499   :  { %v4751_v53 = vpop.eup %4750  ;;  %v2436_v34 = vadd.f32 1.0, %v4749_v50 }
 0x49a   :  { %3115 = vmatpush1.bf16.msra.mxu1 %v4599_v60  ;;  %v4753_v57 = vpop.eup %4752  ;;  %v2437_v44 = vadd.f32 1.0, %v4751_v53 }
 0x49b   :  { %3116 = vmatprep.subr.bf16.mxu1 %v4604_v20  ;;  %v4755_v58 = vpop.eup %4754  ;;  %v2438_v59 = vadd.f32 1.0, %v4753_v57  ;;  %4756 = vrcp.f32 %v2436_v34 }
 0x49c   :  { %v2439_v60 = vadd.f32 1.0, %v4755_v58  ;;  %4758 = vrcp.f32 %v2437_v44  ;;  %v4649_v58 = vld [vmem:[#allocation7 + $0x414] ss:$8 sps:$4 sm:$0xff]   ;;  %v4652_v44 = vld [vmem:[#allocation7 + $0x424] ss:$8 sps:$4 sm:$0xff]  }
 0x49d   :  { %4760 = vrcp.f32 %v2438_v59  ;;  %v4650_v59 = vld [vmem:[#allocation7 + $0x420] ss:$8 sps:$4 sm:$0xff]  }
 0x49e   :  { %3117 = vmatpush1.bf16.msra.mxu1 %v4602_v16  ;;  %4762 = vrcp.f32 %v2439_v60 }
 0x49f   :  { %3118 = vmatprep.subr.bf16.mxu1 %v4607_v22 }
 0x4a2   :  { %3119 = vmatpush1.bf16.msra.mxu1 %v4605_v10 }
 0x4a3   :  { %3120 = vmatprep.subr.bf16.mxu1 %v4610_v38  ;;  %v973_v38 = vadd.f32 %v5131_v27, %v250_v8 }
 0x4a6   :  { %3121 = vmatpush1.bf16.msra.mxu1 %v4608_v28 }
 0x4a7   :  { %3122 = vmatprep.subr.bf16.mxu1 %v4613_v61 }
 0x4aa   :  { %3123 = vmatpush1.bf16.msra.mxu1 %v4611_v0 }
 0x4ab   :  { %3124 = vmatprep.subr.bf16.mxu1 %v4616_v5 }
 0x4ae   :  { %3125 = vmatpush1.bf16.msra.mxu1 %v4614_v6  ;;  %v977_v6 = vadd.f32 %v5135_v29, %v250_v8 }
 0x4af   :  { %3126 = vmatprep.subr.bf16.mxu1 %v4619_v7  ;;  %v983_v7 = vadd.f32 %v5139_v31, %v250_v8 }
 0x4b2   :  { %3127 = vmatpush1.bf16.msra.mxu1 %v4617_v25 }
 0x4b3   :  { %3128 = vmatprep.subr.bf16.mxu1 %v4622_v42 }
 0x4b6   :  { %3129 = vmatpush1.bf16.msra.mxu1 %v4620_v30 }
 0x4b7   :  { %3130 = vmatprep.subr.bf16.mxu1 %v4625_v1 }
 0x4ba   :  { %3131 = vmatpush1.bf16.msra.mxu1 %v4623_v26 }
 0x4bb   :  { %3132 = vmatprep.subr.bf16.mxu1 %v4628_v43  ;;  %v987_v43 = vadd.f32 %v5143_v32, %v250_v8 }
 0x4be   :  { %3133 = vmatpush1.bf16.msra.mxu1 %v4626_v3 }
 0x4bf   :  { %3134 = vmatprep.subr.bf16.mxu1 %v4631_v23 }
 0x4c2   :  { %3135 = vmatpush1.bf16.msra.mxu1 %v4629_v14 }
 0x4c3   :  { %3136 = vmatprep.subr.bf16.mxu1 %v4634_v17  ;;  %v4757_v17 = vpop.eup %4756 }
 0x4c4   :  { %v4759_v29 = vpop.eup %4758 }
 0x4c5   :  { %v4761_v31 = vpop.eup %4760 }
 0x4c6   :  { %3137 = vmatpush1.bf16.msra.mxu1 %v4632_v18  ;;  %v4763_v18 = vpop.eup %4762 }
 0x4c7   :  { %3138 = vmatprep.subr.bf16.mxu1 %v4637_v33  ;;  %v2773_v33 = vsub.f32 1.0, %v4757_v17 }
 0x4ca   :  { %3139 = vmatpush1.bf16.msra.mxu1 %v4635_v35  ;;  %v2775_v35 = vsub.f32 1.0, %v4761_v31 }
 0x4cb   :  { %3140 = vmatprep.subr.bf16.mxu1 %v4640_v36 }
 0x4cc   :  { %v2779_v47 = vmul.f32 %v2775_v35, %v5193_v11  ;;  %v4679_v35 = vld [vmem:[#allocation9 + $0x1a8] sm:$0xff]  }
 0x4ce   :  { %3141 = vmatpush1.bf16.msra.mxu1 %v4638_v37  ;;  %v2774_v37 = vsub.f32 1.0, %v4759_v29 }
 0x4cf   :  { %3142 = vmatprep.subr.bf16.mxu1 %v4643_v39  ;;  %v2777_v39 = vmul.f32 %v2773_v33, %v5188_v63  ;;  %v4678_v33 = vld [vmem:[#allocation9 + $0x1e8] sm:$0xff]  }
 0x4d0   :  { %v2778_v50 = vmul.f32 %v2774_v37, %v5195_v12  ;;  %v4644_v12 = vld [vmem:[#allocation7 + $0x400] ss:$8 sps:$4 sm:$0xff]   ;;  %v4681_v37 = vld [vmem:[#allocation9 + $0x1b0] sm:$0xff]  }
 0x4d2   :  { %3143 = vmatpush1.bf16.msra.mxu1 %v4641_v40  ;;  %v2776_v40 = vsub.f32 1.0, %v4763_v18 }
 0x4d3   :  { %3165 = vmatprep.subr.bf16.mxu1 %v4646_v41 }
 0x4d4   :  { %v2780_v53 = vmul.f32 %v2776_v40, %v5198_v13  ;;  %v4683_v40 = vld [vmem:[#allocation9 + $0x1b8] sm:$0xff]  }
 0x561   :  { %v4050_v19 = vpop.f32.mrb[32].mxu0 }
 0x562   :  { %v4051_v51 = vpop.f32.mrb[33].mxu0 }
 0x563   :  { %v4052_v21 = vadd.f32 %v4051_v51, %v4050_v19  ;;  %v4053_v24 = vpop.f32.mrb[34].mxu0 }
 0x564   :  { %v4054_v55 = vpop.f32.mrb[35].mxu0 }
 0x565   :  { %v4055_v15 = vadd.f32 %v4054_v55, %v4053_v24 }
 0x568   :  { %v4148_v20 = vpop.f32.mrb[28].mxu1 }
 0x569   :  { %v4056_v16 = vpop.f32.mrb[36].mxu0  ;;  %v2750_v22 = vpop.f32.mrb[29].mxu1 }
 0x56a   :  { %v4057_v10 = vpop.f32.mrb[37].mxu0  ;;  %v2751_v28 = vadd.f32 %v4052_v21, %v2750_v22  ;;  %v4149_v0 = vpop.f32.mrb[30].mxu1  ;;  %v4653_v22 = vld [vmem:[#allocation7 + $0x430] ss:$8 sps:$4 sm:$0xff]  }
 0x56b   :  { %v4058_v61 = vadd.f32 %v4057_v10, %v4056_v16  ;;  %v4059_v5 = vpop.f32.mrb[38].mxu0  ;;  %v2753_v46 = vpop.f32.mrb[31].mxu1  ;;  %v4655_v16 = vld [vmem:[#allocation7 + $0x434] ss:$8 sps:$4 sm:$0xff]   ;;  %v4658_v10 = vld [vmem:[#allocation7 + $0x444] ss:$8 sps:$4 sm:$0xff]  }
 0x56c   :  { %v4060_v25 = vpop.f32.mrb[39].mxu0  ;;  %v2765_v42 = vadd.f32 %v2751_v28, %v973_v38  ;;  %v2754_v1 = vadd.f32 %v4055_v15, %v2753_v46  ;;  %v4647_v15 = vld [vmem:[#allocation7 + $0x410] ss:$8 sps:$4 sm:$0xff]   ;;  %v4656_v38 = vld [vmem:[#allocation7 + $0x440] ss:$8 sps:$4 sm:$0xff]  }
 0x56d   :  { %v2759_v30 = vadd.f32 %v4148_v20, %v4058_v61  ;;  %v4061_v26 = vadd.f32 %v4060_v25, %v4059_v5  ;;  %v4661_v28 = vld [vmem:[#allocation7 + $0x454] ss:$8 sps:$4 sm:$0xff]   ;;  %v4659_v61 = vld [vmem:[#allocation7 + $0x450] ss:$8 sps:$4 sm:$0xff]   ;;  %v4662_v5 = vld [vmem:[#allocation7 + $0x460] ss:$8 sps:$4 sm:$0xff]  }
 0x56e   :  { %4764 = vtanh.f32 %v2765_v42  ;;  %v2766_v3 = vadd.f32 %v2754_v1, %v977_v6  ;;  %v4667_v6 = vld [vmem:[#allocation7 + $0x474] ss:$8 sps:$4 sm:$0xff]  }
 0x56f   :  { %v2767_v27 = vadd.f32 %v2759_v30, %v983_v7  ;;  %v2762_v23 = vadd.f32 %v4149_v0, %v4061_v26  ;;  %v4664_v0 = vld [vmem:[#allocation7 + $0x464] ss:$8 sps:$4 sm:$0xff]   ;;  %v4665_v7 = vld [vmem:[#allocation7 + $0x470] ss:$8 sps:$4 sm:$0xff]  }
 0x571   :  { %4766 = vtanh.f32 %v2767_v27  ;;  %v2768_v14 = vadd.f32 %v2762_v23, %v987_v43  ;;  %v4668_v43 = vld [vmem:[#allocation9 + $0x1c0] sm:$0xff]   ;;  %v4671_v23 = vld [vmem:[#allocation9 + $0x188] sm:$0xff]  }
 0x572   :  { %4768 = vtanh.f32 %v2766_v3  ;;  %v4669_v27 = vld [vmem:[#allocation9 + $0x180] sm:$0xff]   ;;  %4072 = vmatprep.subr.bf16.mxu0 %v4668_v43  ;;  %v4670_v3 = vld [vmem:[#allocation9 + $0x1c8] sm:$0xff]  }
 0x573   :  { %4770 = vtanh.f32 %v2768_v14  ;;  %4073 = vmatpush3.bf16.msra.mxu0 %v4669_v27  ;;  %v4672_v14 = vld [vmem:[#allocation9 + $0x1d0] sm:$0xff]   ;;  %v4685_v27 = vld [vmem:[#allocation9 + $0x208] sm:$0xff]  }
 0x574   :  { %4074 = vmatprep.subr.bf16.mxu0 %v4670_v3 }
 0x577   :  { %4075 = vmatpush3.bf16.msra.mxu0 %v4671_v23  ;;  %v4686_v23 = vld [vmem:[#allocation9 + $0x210] sm:$0xff]  }
 0x578   :  { %v4765_v36 = vpop.eup %4764  ;;  %4076 = vmatprep.subr.bf16.mxu0 %v4672_v14 }
 0x579   :  { %v2781_v32 = vmul.f32 %v4765_v36, %v4757_v17  ;;  %v4673_v17 = vld [vmem:[#allocation9 + $0x190] sm:$0xff]  }
 0x57a   :  { %v4680_v36 = vld [vmem:[#allocation9 + $0x1f0] sm:$0xff]  }
 0x57b   :  { %v4767_v41 = vpop.eup %4766  ;;  %v5244_v48 = vadd.f32 %v2781_v32, %v2777_v39  ;;  %4077 = vmatpush3.bf16.msra.mxu0 %v4673_v17  ;;  %v4682_v39 = vld [vmem:[#allocation9 + $0x1f8] sm:$0xff]   ;;  %v4684_v32 = vld [vmem:[#allocation9 + $0x200] sm:$0xff]  }
 0x57c   :  { %v4769_v45 = vpop.eup %4768  ;;  %v2783_v49 = vmul.f32 %v4767_v41, %v4761_v31  ;;  %v4675_v31 = vld [vmem:[#allocation9 + $0x198] sm:$0xff]   ;;  %v253_v41 = vsub.s32 6, %v5153_v9 }
 0x57d   :  { %v4771_v19 = vpop.eup %4770  ;;  %v2782_v51 = vmul.f32 %v4769_v45, %v4759_v29  ;;  %2789 = vst [vmem:[#allocation2 + $0x1] sm:$0xff] %v5244_v48  ;;  %v4674_v29 = vld [vmem:[#allocation9 + $0x1d8] sm:$0xff]   ;;  %v5268_v45 = vld [vmem:[%s5320_s5] sm:$0xff] }
 0x57e   :  { %v5249_v54 = vadd.f32 %v2783_v49, %v2779_v47  ;;  %v2784_v63 = vmul.f32 %v4771_v19, %v4763_v18  ;;  %4078 = vmatprep.subr.bf16.mxu0 %v4674_v29  ;;  %v4677_v18 = vld [vmem:[#allocation9 + $0x1a0] sm:$0xff]   ;;  %v254_v47 = vrot.slane %v5268_v45, %v253_v41 }
 0x57f   :  { %v5251_v21 = vadd.f32 %v2782_v51, %v2778_v50  ;;  %4079 = vmatpush3.bf16.msra.mxu0 %v4675_v31 }
 0x580   :  { %2791 = vst [vmem:[#allocation2 + $0x19] sm:$0xff] %v5249_v54  ;;  %v5254_v24 = vadd.f32 %v2784_v63, %v2780_v53 }
 0x581   :  { %2790 = vst [vmem:[#allocation2 + $0x9] sm:$0xff] %v5251_v21  ;;  %v2818_v11 = vpack.c.bf16 %v5251_v21, %v5244_v48 }
 0x582   :  { %2792 = vst [vmem:[#allocation2 + $0x21] sm:$0xff] %v5254_v24  ;;  %v2821_v34 = vpack.c.bf16 %v5254_v24, %v5249_v54 }
 0x583   :  { %3144 = vmatprep.mubr.bf16.mxu1 %v2818_v11 }
 0x584   :  { %v2805_v13 = vld [vmem:[#allocation2] sm:$0xff] }
 0x587   :  { %v2807_v60 = vld [vmem:[#allocation2 + $0x18] sm:$0xff] }
 0x588   :  { %v2806_v57 = vld [vmem:[#allocation2 + $0x8] sm:$0xff] }
 0x589   :  { %v2817_v55 = vpack.c.bf16 %v2806_v57, %v2805_v13  ;;  %v2808_v8 = vld [vmem:[#allocation2 + $0x20] sm:$0xff]  ;;  %v2814_v25 = vld [vmem:[#allocation2 + $0xa] sm:$0xff] }
 0x58a   :  { %v2820_v20 = vpack.c.bf16 %v2808_v8, %v2807_v60  ;;  %v2813_v46 = vld [vmem:[#allocation2 + $0x2] sm:$0xff]  ;;  %v2815_v30 = vld [vmem:[#allocation2 + $0x1a] sm:$0xff] }
 0x58b   :  { %3145 = vmatmul.mubr.bf16.vlgmr.msra.gmra.mrb[8].mxu1 %v2817_v55  ;;  %v2819_v42 = vpack.c.bf16 %v2814_v25, %v2813_v46  ;;  %v2816_v1 = vld [vmem:[#allocation2 + $0x22] sm:$0xff] }
 0x58c   :  { %3166 = vmatpush1.bf16.msra.mxu1 %v4644_v12  ;;  %3154 = vmatprep.mubr.bf16.mxu1 %v2821_v34  ;;  %v2822_v26 = vpack.c.bf16 %v2816_v1, %v2815_v30 }
 0x58d   :  { %3167 = vmatprep.subr.bf16.mxu1 %v4649_v58 }
 0x590   :  { %3168 = vmatpush1.bf16.msra.mxu1 %v4647_v15 }
 0x591   :  { %3169 = vmatprep.subr.bf16.mxu1 %v4652_v44 }
 0x593   :  { %3155 = vmatmul.mubr.bf16.gmra.mrb[12].mxu1 %v2820_v20 }
 0x594   :  { %3170 = vmatpush1.bf16.msra.mxu1 %v4650_v59  ;;  %3197 = vmatprep.mubr.bf16.mxu1 %v4917_v2 }
 0x595   :  { %3171 = vmatprep.subr.bf16.mxu1 %v4655_v16 }
 0x598   :  { %3172 = vmatpush1.bf16.msra.mxu1 %v4653_v22 }
 0x599   :  { %3173 = vmatprep.subr.bf16.mxu1 %v4658_v10 }
 0x59c   :  { %3174 = vmatpush1.bf16.msra.mxu1 %v4656_v38 }
 0x59d   :  { %3175 = vmatprep.subr.bf16.mxu1 %v4661_v28 }
 0x5a0   :  { %3176 = vmatpush1.bf16.msra.mxu1 %v4659_v61 }
 0x5a1   :  { %3177 = vmatprep.subr.bf16.mxu1 %v4664_v0 }
 0x5a4   :  { %3178 = vmatpush1.bf16.msra.mxu1 %v4662_v5 }
 0x5a5   :  { %3179 = vmatprep.subr.bf16.mxu1 %v4667_v6 }
 0x5a8   :  { %3180 = vmatpush1.bf16.msra.mxu1 %v4665_v7 }
 0x5ab   :  { %3198 = vmatmul.mubr.bf16.vlgmr.msra.gmra.mrb[8].mxu1 %v2819_v42 }
 0x5ac   :  { %3207 = vmatprep.mubr.bf16.mxu1 %v4917_v2  ;;  %v4676_v2 = vld [vmem:[#allocation9 + $0x1e0] sm:$0xff]  }
 0x5ad   :  { %4080 = vmatprep.subr.bf16.mxu0 %v4676_v2 }
 0x5ae   :  { %4081 = vmatpush3.bf16.msra.mxu0 %v4677_v18  ;;  %v4687_v18 = vld [vmem:[#allocation9 + $0x218] sm:$0xff]  }
 0x5af   :  { %4082 = vmatprep.subr.bf16.mxu0 %v4678_v33 }
 0x5b2   :  { %4083 = vmatpush3.bf16.msra.mxu0 %v4679_v35  ;;  %v4688_v35 = vld [vmem:[#allocation9 + $0x220] sm:$0xff]  }
 0x5b3   :  { %3208 = vmatmul.mubr.bf16.gmra.mrb[12].mxu1 %v2822_v26  ;;  %4084 = vmatprep.subr.bf16.mxu0 %v4680_v36  ;;  %v4689_v36 = vld [vmem:[#allocation9 + $0x228] sm:$0xff]  }
 0x5b6   :  { %4085 = vmatpush3.bf16.msra.mxu0 %v4681_v37  ;;  %v4690_v37 = vld [vmem:[#allocation9 + $0x230] sm:$0xff]  }
 0x5b7   :  { %4086 = vmatprep.subr.bf16.mxu0 %v4682_v39  ;;  %v4691_v39 = vld [vmem:[#allocation9 + $0x238] sm:$0xff]  }
 0x5ba   :  { %4087 = vmatpush3.bf16.msra.mxu0 %v4683_v40 }
 0x5bb   :  { %4150 = vmatprep.subr.bf16.mxu0 %v4684_v32 }
 0x67e   :  { %v3199_v49 = vpop.f32.mrb[8].mxu1 }
 0x67f   :  { %v4178_v19 = vadd.f32 %v3199_v49, %v254_v47  ;;  %v5271_v50 = vpop.f32.mrb[9].mxu1 }
 0x680   :  { %v3203_v51 = vpop.f32.mrb[10].mxu1 }
 0x681   :  { %v3964_v53 = vmul.f32 -1.442695, %v4178_v19  ;;  %v4180_v63 = vadd.f32 %v3203_v51, %v254_v47  ;;  %v5273_v11 = vpop.f32.mrb[11].mxu1 }
 0x683   :  { %4772 = vpow2.f32 %v3964_v53  ;;  %v3965_v12 = vmul.f32 -1.442695, %v4180_v63 }
 0x685   :  { %4774 = vpow2.f32 %v3965_v12 }
 0x686   :  { %v3209_v13 = vpop.f32.mrb[12].mxu1 }
 0x687   :  { %v4182_v57 = vadd.f32 %v3209_v13, %v254_v47  ;;  %v5275_v55 = vpop.f32.mrb[13].mxu1 }
 0x688   :  { %v3213_v58 = vpop.f32.mrb[14].mxu1 }
 0x689   :  { %v3966_v34 = vmul.f32 -1.442695, %v4182_v57  ;;  %v4184_v15 = vadd.f32 %v3213_v58, %v254_v47  ;;  %v5277_v44 = vpop.f32.mrb[15].mxu1  ;;  %v257_v47 = vsub.s32 7, %v5153_v9 }
 0x68b   :  { %4776 = vpow2.f32 %v3966_v34  ;;  %v3967_v8 = vmul.f32 -1.442695, %v4184_v15  ;;  %v258_v63 = vrot.slane %v5268_v45, %v257_v47 }
 0x68d   :  { %v4773_v59 = vpop.eup %4772  ;;  %4778 = vpow2.f32 %v3967_v8  ;;  %v4183_v57 = vadd.f32 %v5275_v55, %v258_v63  ;;  %v4179_v58 = vadd.f32 %v5271_v50, %v258_v63  ;;  %v4185_v34 = vadd.f32 %v5277_v44, %v258_v63 }
 0x68e   :  { %v3234_v60 = vadd.f32 1.0, %v4773_v59  ;;  %v4181_v8 = vadd.f32 %v5273_v11, %v258_v63 }
 0x68f   :  { %v4775_v20 = vpop.eup %4774 }
 0x690   :  { %4780 = vrcp.f32 %v3234_v60  ;;  %v3235_v16 = vadd.f32 1.0, %v4775_v20  ;;  %v3970_v60 = vmul.f32 -1.442695, %v4183_v57  ;;  %v3969_v45 = vmul.f32 -1.442695, %v4181_v8 }
 0x692   :  { %4782 = vrcp.f32 %v3235_v16  ;;  %v3968_v16 = vmul.f32 -1.442695, %v4179_v58 }
 0x695   :  { %v4777_v22 = vpop.eup %4776 }
 0x696   :  { %v3236_v10 = vadd.f32 1.0, %v4777_v22 }
 0x697   :  { %v4779_v38 = vpop.eup %4778 }
 0x698   :  { %4784 = vrcp.f32 %v3236_v10  ;;  %v3237_v28 = vadd.f32 1.0, %v4779_v38  ;;  %v3971_v10 = vmul.f32 -1.442695, %v4185_v34 }
 0x69a   :  { %v4781_v61 = vpop.eup %4780  ;;  %4786 = vrcp.f32 %v3237_v28 }
 0x69b   :  { %v3274_v0 = vmul.f32 %v4781_v61, %v5244_v48  ;;  %4788 = vpow2.f32 %v3970_v60 }
 0x69c   :  { %v4783_v5 = vpop.eup %4782  ;;  %4790 = vpow2.f32 %v3968_v16 }
 0x69d   :  { %3278 = vst [vmem:[#allocation2 + $0x1] sm:$0xff] %v3274_v0  ;;  %v3275_v6 = vmul.f32 %v4783_v5, %v5251_v21  ;;  %4792 = vpow2.f32 %v3971_v10 }
 0x69e   :  { %4794 = vpow2.f32 %v3969_v45 }
 0x69f   :  { %3279 = vst [vmem:[#allocation2 + $0x9] sm:$0xff] %v3275_v6  ;;  %v3295_v7 = vpack.c.bf16 %v3275_v6, %v3274_v0  ;;  %v3637_v6 = vld [vmem:[%s5320_s5 + $0x8] ss:$0 sm:$0xff]  ;;  %s4918_s5 = smov [#allocation10]  }
 0x6a0   :  { %s3624_s24 = sshll.u32 %s4918_s5, 4  ;;  %s3625_s24 = int_to_ptr.vmem [resolvable:$true] %s3624_s24 }
 0x6a1   :  { %3525 = vmatprep.mubr.bf16.mxu0 %v3295_v7  ;;  %s4879_s25 = scalar_lea.vmem %s3625_s24, 512  ;;  %p4884_p11 = scmp.lt.s32.totalorder %s3625_s24, %s3625_s24 }
 0x6a2   :  { %v4785_v46 = vpop.eup %4784  ;;  %p4880_p10 = scmp.ne.s32.totalorder %s3625_s24, %s4879_s25  ;;  %p4885_p12 = scmp.lt.s32.totalorder %s4879_s25, %s4879_s25 }
 0x6a3   :  { %v3276_v25 = vmul.f32 %v4785_v46, %v5249_v54  ;;  %v1085_v46 = vadd.f32 %v3637_v6, %v5149_v62 }
 0x6a4   :  { %v4787_v42 = vpop.eup %4786  ;;  %v3282_v1 = vld [vmem:[#allocation2] sm:$0xff]  ;;  %p4886_p13 = por %p4885_p12, %p4884_p11 }
 0x6a5   :  { %3280 = vst [vmem:[#allocation2 + $0x19] sm:$0xff] %v3276_v25  ;;  %v3277_v30 = vmul.f32 %v4787_v42, %v5254_v24  ;;  %v4789_v55 = vpop.eup %4788 }
 0x6a6   :  { %v3283_v26 = vld [vmem:[#allocation2 + $0x8] sm:$0xff]  ;;  %v4791_v50 = vpop.eup %4790  ;;  %v3264_v61 = vadd.f32 1.0, %v4789_v55  ;;  %p4887_p0 = pnand %p4886_p13, %p4880_p10 }
 0x6a7   :  { %3281 = vst [vmem:[#allocation2 + $0x21] sm:$0xff] %v3277_v30  ;;  %v3294_v43 = vpack.c.bf16 %v3283_v26, %v3282_v1  ;;  %v3298_v3 = vpack.c.bf16 %v3277_v30, %v3276_v25  ;;  %v3290_v14 = vld [vmem:[#allocation2 + $0x2] sm:$0xff]  ;;  %v3291_v17 = vld [vmem:[#allocation2 + $0xa] sm:$0xff]  ;;  %v4793_v28 = vpop.eup %4792  ;;  %v3262_v0 = vadd.f32 1.0, %v4791_v50  ;;  %v1077_v30 = vadd.f32 %v3637_v6, %v5145_v52 }
 0x6a8   :  { %v3296_v33 = vpack.c.bf16 %v3291_v17, %v3290_v14  ;;  %v4795_v44 = vpop.eup %4794  ;;  %v3265_v11 = vadd.f32 1.0, %v4793_v28  ;;  %4796 = vrcp.f32 %v3264_v61  ;;  %v1080_v14 = vadd.f32 %v3637_v6, %v5147_v56 }
 0x6a9   :  { %3526 = vmatmul.mubr.bf16.vlgmr.msra.gmra.mrb[40].mxu0 %v3294_v43  ;;  %v3263_v5 = vadd.f32 1.0, %v4795_v44  ;;  %4798 = vrcp.f32 %v3262_v0  ;;  %v1088_v43 = vadd.f32 %v3637_v6, %v5151_v4 }
 0x6aa   :  { %4151 = vmatpush3.bf16.msra.mxu0 %v4684_v32  ;;  %3533 = vmatprep.mubr.bf16.mxu0 %v3298_v3  ;;  %4800 = vrcp.f32 %v3265_v11 }
 0x6ab   :  { %4152 = vmatprep.subr.bf16.mxu0 %v4685_v27  ;;  %4802 = vrcp.f32 %v3263_v5 }
 0x6ac   :  { %v3284_v29 = vld [vmem:[#allocation2 + $0x18] sm:$0xff] }
 0x6ae   :  { %4153 = vmatpush3.bf16.msra.mxu0 %v4685_v27  ;;  %v3285_v31 = vld [vmem:[#allocation2 + $0x20] sm:$0xff] }
 0x6af   :  { %4154 = vmatprep.subr.bf16.mxu0 %v4686_v23  ;;  %v3297_v2 = vpack.c.bf16 %v3285_v31, %v3284_v29  ;;  %v3292_v40 = vld [vmem:[#allocation2 + $0x1a] sm:$0xff]  ;;  %v3293_v32 = vld [vmem:[#allocation2 + $0x22] sm:$0xff] }
 0x6b0   :  { %v3299_v41 = vpack.c.bf16 %v3293_v32, %v3292_v40 }
 0x6b1   :  { %3534 = vmatmul.mubr.bf16.gmra.mrb[44].mxu0 %v3297_v2 }
 0x6b2   :  { %4155 = vmatpush3.bf16.msra.mxu0 %v4686_v23  ;;  %4166 = vmatprep.mubr.bf16.mxu0 %v3296_v33  ;;  %v4797_v2 = vpop.eup %4796 }
 0x6b3   :  { %4156 = vmatprep.subr.bf16.mxu0 %v4687_v18  ;;  %v4799_v52 = vpop.eup %4798 }
 0x6b6   :  { %4157 = vmatpush3.bf16.msra.mxu0 %v4687_v18  ;;  %v4801_v18 = vpop.eup %4800 }
 0x6b7   :  { %4158 = vmatprep.subr.bf16.mxu0 %v4688_v35  ;;  %v4803_v33 = vpop.eup %4802  ;;  %v3602_v4 = vsub.f32 1.0, %v4801_v18 }
 0x6ba   :  { %4159 = vmatpush3.bf16.msra.mxu0 %v4688_v35  ;;  %v3601_v35 = vsub.f32 1.0, %v4797_v2 }
 0x6bb   :  { %4160 = vmatprep.subr.bf16.mxu0 %v4689_v36 }
 0x6bc   :  { %v3605_v56 = vmul.f32 %v3601_v35, %v5249_v54 }
 0x6be   :  { %4161 = vmatpush3.bf16.msra.mxu0 %v4689_v36  ;;  %v3599_v36 = vsub.f32 1.0, %v4799_v52 }
 0x6bf   :  { %4162 = vmatprep.subr.bf16.mxu0 %v4690_v37 }
 0x6c0   :  { %v3603_v47 = vmul.f32 %v3599_v36, %v5244_v48 }
 0x6c2   :  { %4163 = vmatpush3.bf16.msra.mxu0 %v4690_v37 }
 0x6c3   :  { %4164 = vmatprep.subr.bf16.mxu0 %v4691_v39 }
 0x6c6   :  { %4165 = vmatpush3.bf16.msra.mxu0 %v4691_v39  ;;  %v3600_v39 = vsub.f32 1.0, %v4803_v33 }
 0x6c9   :  { %4167 = vmatmul.mubr.bf16.vlgmr.msra.gmra.mrb[48].mxu0 %v3299_v41 }
 0x77c   :  { %v4088_v49 = vpop.f32.mrb[40].mxu0 }
 0x77d   :  { %v4089_v19 = vpop.f32.mrb[41].mxu0 }
 0x77e   :  { %v4090_v51 = vadd.f32 %v4089_v19, %v4088_v49  ;;  %v4091_v53 = vpop.f32.mrb[42].mxu0 }
 0x77f   :  { %v4092_v12 = vpop.f32.mrb[43].mxu0 }
 0x780   :  { %v4093_v13 = vadd.f32 %v4092_v12, %v4091_v53  ;;  %v3604_v12 = vmul.f32 %v3600_v39, %v5251_v21 }
 0x784   :  { %v4094_v15 = vpop.f32.mrb[44].mxu0 }
 0x785   :  { %v4095_v59 = vpop.f32.mrb[45].mxu0 }
 0x786   :  { %v4096_v9 = vadd.f32 %v4095_v59, %v4094_v15  ;;  %v4097_v20 = vpop.f32.mrb[46].mxu0 }
 0x787   :  { %v4098_v22 = vpop.f32.mrb[47].mxu0 }
 0x788   :  { %v4099_v38 = vadd.f32 %v4098_v22, %v4097_v20 }
 0x79c   :  { %v4168_v7 = vpop.f32.mrb[48].mxu0 }
 0x79d   :  { %v3585_v25 = vadd.f32 %v4168_v7, %v4096_v9  ;;  %v3576_v42 = vpop.f32.mrb[49].mxu0 }
 0x79e   :  { %v3577_v1 = vadd.f32 %v4090_v51, %v3576_v42  ;;  %v4169_v26 = vpop.f32.mrb[50].mxu0  ;;  %v3606_v51 = vmul.f32 %v3602_v4, %v5254_v24 }
 0x79f   :  { %v3593_v27 = vadd.f32 %v3585_v25, %v1085_v46  ;;  %v3588_v3 = vadd.f32 %v4169_v26, %v4099_v38  ;;  %v3579_v23 = vpop.f32.mrb[51].mxu0 }
 0x7a0   :  { %v3591_v17 = vadd.f32 %v3577_v1, %v1077_v30  ;;  %v3580_v29 = vadd.f32 %v4093_v13, %v3579_v23 }
 0x7a1   :  { %4804 = vtanh.f32 %v3593_v27  ;;  %v3594_v31 = vadd.f32 %v3588_v3, %v1088_v43 }
 0x7a2   :  { %4806 = vtanh.f32 %v3591_v17  ;;  %v3592_v62 = vadd.f32 %v3580_v29, %v1080_v14 }
 0x7a3   :  { %4808 = vtanh.f32 %v3594_v31 }
 0x7a4   :  { %4810 = vtanh.f32 %v3592_v62 }
 0x7ab   :  { %v4805_v37 = vpop.eup %4804 }
 0x7ac   :  { %v4807_v40 = vpop.eup %4806  ;;  %v3609_v32 = vmul.f32 %v4805_v37, %v4797_v2 }
 0x7ad   :  { %v4809_v41 = vpop.eup %4808  ;;  %v3607_v49 = vmul.f32 %v4807_v40, %v4799_v52 }
 0x7ae   :  { %v4811_v19 = vpop.eup %4810  ;;  %v3610_v53 = vmul.f32 %v4809_v41, %v4801_v18  ;;  %v3613_v63 = vadd.f32 %v3609_v32, %v3605_v56 }
 0x7af   :  { %v3608_v13 = vmul.f32 %v4811_v19, %v4803_v33  ;;  %v3611_v57 = vadd.f32 %v3607_v49, %v3603_v47 }
 0x7b0   :  { %v3614_v58 = vadd.f32 %v3610_v53, %v3606_v51  ;;  %3617 = vst [vmem:[#allocation10 + $0x10] sm:$0xff] %v3613_v63 }
 0x7b1   :  { %v3612_v34 = vadd.f32 %v3608_v13, %v3604_v12  ;;  %3615 = vst [vmem:[#allocation10] sm:$0xff] %v3611_v57 }
 0x7b2   :  { %3618 = vst [vmem:[#allocation10 + $0x18] sm:$0xff] %v3614_v58 }
 0x7b3   :  { %3616 = vst [vmem:[#allocation10 + $0x8] sm:$0xff] %v3612_v34 }
 0x7b4   :  { %4890 = shalt.err (!%p4887_p0)
}
 0x7b5   :  { %s4891_s28 = scalar_lea.hbm %s5321_s6, 512 }
 0x7b6   :  { %p4892_p1 = scmp.ne.s32.totalorder %s5321_s6, %s4891_s28  ;;  %p4895_p2 = scmp.lt.u32.totalorder %s4891_s28, %s5321_s6 }
 0x7b8   :  { %p4897_p3 = pnand %p4895_p2, %p4892_p1 }
 0x7ba   :  { %4900 = shalt.err (!%p4897_p3)
}
 0x7bb   :  { %3630 = dma.vmem_to_hbm [thread:$0]  %s3625_s24, 512, %s5321_s6, [#allocation6], %s4908_s7, %s4908_s7, %s4909_s8  }
 0x7bc   :  { %4905 = dma.done.wait [#allocation6], 512  }
 0x7bd   :  { %4906 = vsyncadd [#allocation6], 4294966784 }
 0x7be   :  { %3634 = vsyncpa [#allocation5], 1 }
 0x7bf   :  { %3635 = vsyncpa [#allocation8], 1 }
 0x7c0   :  { %3636 = vsyncpa [#allocation6], 1 }

</bundles_post_ra>
